<compile_context>
chip_gen: v7x
topology: tpu7x:2x2x1
jax: 0.10.0
libtpu: 0.0.40
codegen_flags: <defaults>
</compile_context>

<pallas_src>
import functools

import jax
import jax.numpy as jnp
from jax import lax
from jax.experimental import pallas as pl
from jax.experimental.pallas import tpu as pltpu


def _round_up(v, m):
    return -(-v // m) * m


def _ae_fused_kernel(x_ref, we_ref, be_ref, wd_ref, bd_ref, mask_ref, o_ref,
                     rhs_e_ref, rhs_d_ref,
                     *, shifts, cin, cout, cin_pad, cout_pad):
    """Fused AE forward for one block of images (batch folded onto lanes).

    x_ref    : (cin, lanes)             input, channels on sublanes, batch*H*W on lanes
    we_ref   : (cout, K*K*cin_pad)      stacked encoder weight (zeros in padded columns)
    be_ref   : (cout, 1)                encoder bias
    wd_ref   : (cin, K*K*cout_pad)      stacked decoder (flipped-conv) weight
    bd_ref   : (cin, 1)                 decoder bias
    mask_ref : (K*K, 1, lanes)          per-tap validity mask (0 where tap reads padding)
    o_ref    : (cin, lanes)             output
    rhs_e_ref: (K*K*cin_pad, lanes)     VMEM scratch, stacked encoder RHS
    rhs_d_ref: (K*K*cout_pad, lanes)    VMEM scratch, stacked decoder RHS
    """
    x = x_ref[...]                                            # (cin, lanes)

    # Zero only the scratches that have padded sublane rows, so the (zero) weight
    # columns never multiply uninitialized VMEM.  Static Python conditions; done every
    # step so grid steps stay independent (megacore-shardable).
    if cin_pad != cin:
        rhs_e_ref[...] = jnp.zeros_like(rhs_e_ref)
    if cout_pad != cout:
        rhs_d_ref[...] = jnp.zeros_like(rhs_d_ref)

    # ---- encoder: Conv2d (stride 1, 'same') as ONE stacked-tap MXU matmul ----
    for t, d in enumerate(shifts):
        xs = x if d == 0 else jnp.roll(x, -d, axis=1)         # xs[:, p] = x[:, p + d]
        rhs_e_ref[pl.ds(t * cin_pad, cin), :] = xs * mask_ref[t]
    h = (jnp.dot(we_ref[...], rhs_e_ref[...],
                 preferred_element_type=jnp.float32)
         + be_ref[...])                                       # (cout, lanes)

    # ---- dropout (eval mode) = identity; h stays resident on-chip ----
    # TODO(synk): training-mode dropout (p=0.5) would use pltpu.prng_seed +
    # pltpu.prng_random_bits with the 1/(1-p) rescale.

    # ---- decoder: ConvTranspose2d (stride 1) as flipped-kernel conv, same trick ----
    for t, d in enumerate(shifts):
        hs = h if d == 0 else jnp.roll(h, -d, axis=1)
        rhs_d_ref[pl.ds(t * cout_pad, cout), :] = hs * mask_ref[t]
    o_ref[...] = (jnp.dot(wd_ref[...], rhs_d_ref[...],
                          preferred_element_type=jnp.float32)
                  + bd_ref[...]).astype(o_ref.dtype)


def init_ae_params(key, in_features, out_features, kernel):
    """Deterministic synthetic parameters in PyTorch layouts."""
    k1, k2, k3, k4 = jax.random.split(key, 4)
    scale_e = 1.0 / (in_features * kernel * kernel) ** 0.5
    scale_d = 1.0 / (out_features * kernel * kernel) ** 0.5
    # encoder: Conv2d weight (Cout, Cin, K, K), bias (Cout,)
    w_enc = jax.random.uniform(k1, (out_features, in_features, kernel, kernel),
                               jnp.float32, -scale_e, scale_e)
    b_enc = jax.random.uniform(k2, (out_features,), jnp.float32, -scale_e, scale_e)
    # decoder: ConvTranspose2d weight (in_ch=Cout, out_ch=Cin, K, K), bias (Cin,)
    w_dec = jax.random.uniform(k3, (out_features, in_features, kernel, kernel),
                               jnp.float32, -scale_d, scale_d)
    b_dec = jax.random.uniform(k4, (in_features,), jnp.float32, -scale_d, scale_d)
    return dict(w_enc=w_enc, b_enc=b_enc, w_dec=w_dec, b_dec=b_dec)


def prepare_ae_params(params, kernel, padding, height, width):
    """One-time re-layout of PyTorch params into stacked lane-dense LHS matrices,
    plus precomputed tap shifts and validity masks for the fused kernel."""
    K, p, H, W = kernel, padding, height, width
    # Specialized to stride=1 'same' convs (2*padding == K-1), which AE(k=3, p=1) uses:
    # the decoder-as-conv then needs padding K-1-p == p, so encoder/decoder share masks.
    assert 2 * p == K - 1, "fused AE kernel requires stride=1 and 2*padding == kernel-1"
    cout, cin = params["w_enc"].shape[0], params["w_enc"].shape[1]
    KK = K * K
    cin_pad = _round_up(cin, 8)
    cout_pad = _round_up(cout, 8)
    hw = H * W

    # encoder Conv2d weight (Cout, Cin, K, K) -> stacked LHS (Cout, K*K*cin_pad),
    # zeros in the sublane-padding columns of every tap group.
    we_taps = jnp.transpose(params["w_enc"], (2, 3, 0, 1)).reshape(KK, cout, cin)
    we_taps = jnp.pad(we_taps, ((0, 0), (0, 0), (0, cin_pad - cin)))
    we = jnp.transpose(we_taps, (1, 0, 2)).reshape(cout, KK * cin_pad)
    be = params["b_enc"].reshape(cout, 1)

    # decoder ConvTranspose2d weight (Cout, Cin, K, K); equivalent stride-1 conv weight
    #   wd[t, o, c] = w_dec[c, o, K-1-kh, K-1-kw]  (t = kh*K + kw), then stacked LHS.
    wd_taps = jnp.transpose(jnp.flip(params["w_dec"], axis=(2, 3)),
                            (2, 3, 1, 0)).reshape(KK, cin, cout)
    wd_taps = jnp.pad(wd_taps, ((0, 0), (0, 0), (0, cout_pad - cout)))
    wd = jnp.transpose(wd_taps, (1, 0, 2)).reshape(cin, KK * cout_pad)
    bd = params["b_dec"].reshape(cin, 1)

    # Per-tap flat lane shift and validity mask on one (H, W) image.
    ii = jnp.arange(H).reshape(H, 1)
    jj = jnp.arange(W).reshape(1, W)
    masks, shifts = [], []
    for kh in range(K):
        for kw in range(K):
            di, dj = kh - p, kw - p
            valid = ((ii + di >= 0) & (ii + di < H) &
                     (jj + dj >= 0) & (jj + dj < W))
            masks.append(valid.reshape(1, hw))
            shifts.append(di * W + dj)
    mask = jnp.stack(masks, axis=0).astype(jnp.float32)   # (K*K, 1, hw)

    return dict(we=we, be=be, wd=wd, bd=bd, mask=mask, shifts=tuple(shifts),
                K=K, cin=cin, cout=cout, cin_pad=cin_pad, cout_pad=cout_pad)


def ae_forward(prep, x_nchw, *, max_lanes=32 * 256):
    """AE.forward: encoder conv -> dropout (eval: identity) -> transposed conv."""
    N, cin, H, W = x_nchw.shape
    assert cin == prep["cin"]
    cout, K = prep["cout"], prep["K"]
    cin_pad, cout_pad = prep["cin_pad"], prep["cout_pad"]
    KK = K * K
    hw = H * W

    # Pick how many images share one grid step (folded onto the lane axis).  Lane width
    # of a partial block must stay a multiple of 128; cap it to keep VMEM headroom
    # (matters on v7x's smaller VMEM if N / H*W are scaled up).
    if hw % 128 == 0:
        b_blk = 1
        for d in range(N, 0, -1):
            if N % d == 0 and d * hw <= max(max_lanes, hw):
                b_blk = d
                break
    else:
        b_blk = N            # block must span the full lane dim if hw isn't 128-aligned
    lanes_blk = b_blk * hw
    grid_n = N // b_blk

    # Lane-dense slab: channels on sublanes, (batch, spatial) batch-major on lanes.
    x2 = x_nchw.reshape(N, cin, hw).transpose(1, 0, 2).reshape(cin, N * hw)
    mask_blk = jnp.tile(prep["mask"], (1, 1, b_blk))       # (K*K, 1, lanes_blk)

    kernel = functools.partial(_ae_fused_kernel, shifts=prep["shifts"],
                               cin=cin, cout=cout, cin_pad=cin_pad, cout_pad=cout_pad)
    out2 = pl.pallas_call(
        kernel,
        out_shape=jax.ShapeDtypeStruct((cin, N * hw), jnp.float32),
        grid=(grid_n,),
        in_specs=[
            pl.BlockSpec((cin, lanes_blk), lambda g: (0, g)),
            pl.BlockSpec((cout, KK * cin_pad), lambda g: (0, 0)),
            pl.BlockSpec((cout, 1), lambda g: (0, 0)),
            pl.BlockSpec((cin, KK * cout_pad), lambda g: (0, 0)),
            pl.BlockSpec((cin, 1), lambda g: (0, 0)),
            pl.BlockSpec((KK, 1, lanes_blk), lambda g: (0, 0, 0)),
        ],
        out_specs=pl.BlockSpec((cin, lanes_blk), lambda g: (0, g)),
        scratch_shapes=[
            pltpu.VMEM((KK * cin_pad, lanes_blk), jnp.float32),   # stacked encoder RHS
            pltpu.VMEM((KK * cout_pad, lanes_blk), jnp.float32),  # stacked decoder RHS
        ],
        compiler_params=pltpu.CompilerParams(
            dimension_semantics=("parallel",)),   # batch-block axis; shardable on v7x
    )(x2, prep["we"], prep["be"], prep["wd"], prep["bd"], mask_blk)

    return out2.reshape(cin, N, hw).transpose(1, 0, 2).reshape(N, cin, H, W)


if __name__ == "__main__":
    # Small shapes consistent with the module: batch=2, in_features=4,
    # out_features=8, kernel=3, stride=1, padding=1, spatial 16x16.
    N, Cin, Cout, K, P, H, W = 2, 4, 8, 3, 1, 16, 16

    key = jax.random.PRNGKey(0)
    kx, kp = jax.random.split(key)
    x = jax.random.normal(kx, (N, Cin, H, W), jnp.float32)
    params = init_ae_params(kp, Cin, Cout, K)
    prep = prepare_ae_params(params, K, P, H, W)

    out = jax.block_until_ready(ae_forward(prep, x))
    assert out.shape == (N, Cin, H, W), out.shape

    # Pure-JAX reference (same math via XLA conv) for a correctness check.
    h_ref = lax.conv_general_dilated(
        x, params["w_enc"], (1, 1), ((P, P), (P, P)),
        dimension_numbers=("NCHW", "OIHW", "NCHW")
    ) + params["b_enc"][None, :, None, None]
    w_dec_conv = jnp.transpose(jnp.flip(params["w_dec"], axis=(2, 3)), (1, 0, 2, 3))
    q = K - 1 - P
    y_ref = lax.conv_general_dilated(
        h_ref, w_dec_conv, (1, 1), ((q, q), (q, q)),
        dimension_numbers=("NCHW", "OIHW", "NCHW")
    ) + params["b_dec"][None, :, None, None]

    assert jnp.allclose(out, y_ref, atol=1e-4, rtol=1e-4), (
        float(jnp.max(jnp.abs(out - y_ref))))
    print("KERNEL_OK")
</pallas_src>

<mosaic_0001>
module attributes {stable_mosaic.version = 11 : i64} {
  func.func @_ae_fused_kernel(%arg0: i32, %arg1: memref<4x512xf32, #tpu.memory_space<vmem>>, %arg2: memref<8x72xf32, #tpu.memory_space<vmem>>, %arg3: memref<8x1xf32, #tpu.memory_space<vmem>>, %arg4: memref<4x72xf32, #tpu.memory_space<vmem>>, %arg5: memref<4x1xf32, #tpu.memory_space<vmem>>, %arg6: memref<9x1x512xf32, #tpu.memory_space<vmem>>, %arg7: memref<4x512xf32, #tpu.memory_space<vmem>>, %arg8: memref<72x512xf32, #tpu.memory_space<vmem>>, %arg9: memref<72x512xf32, #tpu.memory_space<vmem>>) attributes {dimension_semantics = [#tpu.dimension_semantics<parallel>], iteration_bounds = array<i64: 1>, scalar_prefetch = 0 : i64, scratch_operands = 2 : i64, tpu.core_type = #tpu.core_type<tc>, window_params = [{transform_indices = @transform_0, window_bounds = array<i64: 4, 512>}, {pipeline_mode = #tpu.pipeline_mode<synchronous>, transform_indices = @transform_1, window_bounds = array<i64: 8, 72>}, {pipeline_mode = #tpu.pipeline_mode<synchronous>, transform_indices = @transform_2, window_bounds = array<i64: 8, 1>}, {pipeline_mode = #tpu.pipeline_mode<synchronous>, transform_indices = @transform_3, window_bounds = array<i64: 4, 72>}, {pipeline_mode = #tpu.pipeline_mode<synchronous>, transform_indices = @transform_4, window_bounds = array<i64: 4, 1>}, {pipeline_mode = #tpu.pipeline_mode<synchronous>, transform_indices = @transform_5, window_bounds = array<i64: 9, 1, 512>}, {transform_indices = @transform_6, window_bounds = array<i64: 4, 512>}]} {
    %c0 = arith.constant 0 : index
    %c0_0 = arith.constant 0 : index
    %0 = vector.load %arg1[%c0, %c0_0] : memref<4x512xf32, #tpu.memory_space<vmem>>, vector<4x512xf32>
    %cst = arith.constant 0.000000e+00 : f32
    %1 = vector.broadcast %cst : f32 to vector<72x512xf32>
    %c0_1 = arith.constant 0 : index
    %c0_2 = arith.constant 0 : index
    %2 = vector.load %arg8[%c0_1, %c0_2] : memref<72x512xf32, #tpu.memory_space<vmem>>, vector<72x512xf32>
    tpu.vector_store %arg8[%c0_1, %c0_2], %1 {strides = array<i32>} : memref<72x512xf32, #tpu.memory_space<vmem>>, vector<72x512xf32>,
    %3 = vector.extract_strided_slice %0 {offsets = [0, 495], sizes = [4, 17], strides = [1, 1]} : vector<4x512xf32> to vector<4x17xf32>
    %4 = vector.extract_strided_slice %0 {offsets = [0, 0], sizes = [4, 495], strides = [1, 1]} : vector<4x512xf32> to vector<4x495xf32>
    %5 = tpu.concatenate %3, %4 in 1 : vector<4x17xf32>, vector<4x495xf32> -> vector<4x512xf32>
    %c0_3 = arith.constant 0 : index
    %c0_4 = arith.constant 0 : index
    %c0_5 = arith.constant 0 : index
    %6 = vector.load %arg6[%c0_3, %c0_4, %c0_5] : memref<9x1x512xf32, #tpu.memory_space<vmem>>, vector<1x1x512xf32>
    %7 = vector.shape_cast %6 : vector<1x1x512xf32> to vector<1x512xf32>
    %8 = vector.broadcast %7 : vector<1x512xf32> to vector<4x512xf32>
    %9 = arith.mulf %5, %8 : vector<4x512xf32>
    %c0_6 = arith.constant 0 : index
    %c0_7 = arith.constant 0 : index
    %10 = vector.load %arg8[%c0_6, %c0_7] : memref<72x512xf32, #tpu.memory_space<vmem>>, vector<4x512xf32>
    tpu.vector_store %arg8[%c0_6, %c0_7], %9 {strides = array<i32>} : memref<72x512xf32, #tpu.memory_space<vmem>>, vector<4x512xf32>,
    %11 = vector.extract_strided_slice %0 {offsets = [0, 496], sizes = [4, 16], strides = [1, 1]} : vector<4x512xf32> to vector<4x16xf32>
    %12 = vector.extract_strided_slice %0 {offsets = [0, 0], sizes = [4, 496], strides = [1, 1]} : vector<4x512xf32> to vector<4x496xf32>
    %13 = tpu.concatenate %11, %12 in 1 : vector<4x16xf32>, vector<4x496xf32> -> vector<4x512xf32>
    %c1 = arith.constant 1 : index
    %c0_8 = arith.constant 0 : index
    %c0_9 = arith.constant 0 : index
    %14 = vector.load %arg6[%c1, %c0_8, %c0_9] : memref<9x1x512xf32, #tpu.memory_space<vmem>>, vector<1x1x512xf32>
    %15 = vector.shape_cast %14 : vector<1x1x512xf32> to vector<1x512xf32>
    %16 = vector.broadcast %15 : vector<1x512xf32> to vector<4x512xf32>
    %17 = arith.mulf %13, %16 : vector<4x512xf32>
    %c8 = arith.constant 8 : index
    %c0_10 = arith.constant 0 : index
    %18 = vector.load %arg8[%c8, %c0_10] : memref<72x512xf32, #tpu.memory_space<vmem>>, vector<4x512xf32>
    tpu.vector_store %arg8[%c8, %c0_10], %17 {strides = array<i32>} : memref<72x512xf32, #tpu.memory_space<vmem>>, vector<4x512xf32>,
    %19 = vector.extract_strided_slice %0 {offsets = [0, 497], sizes = [4, 15], strides = [1, 1]} : vector<4x512xf32> to vector<4x15xf32>
    %20 = vector.extract_strided_slice %0 {offsets = [0, 0], sizes = [4, 497], strides = [1, 1]} : vector<4x512xf32> to vector<4x497xf32>
    %21 = tpu.concatenate %19, %20 in 1 : vector<4x15xf32>, vector<4x497xf32> -> vector<4x512xf32>
    %c2 = arith.constant 2 : index
    %c0_11 = arith.constant 0 : index
    %c0_12 = arith.constant 0 : index
    %22 = vector.load %arg6[%c2, %c0_11, %c0_12] : memref<9x1x512xf32, #tpu.memory_space<vmem>>, vector<1x1x512xf32>
    %23 = vector.shape_cast %22 : vector<1x1x512xf32> to vector<1x512xf32>
    %24 = vector.broadcast %23 : vector<1x512xf32> to vector<4x512xf32>
    %25 = arith.mulf %21, %24 : vector<4x512xf32>
    %c16 = arith.constant 16 : index
    %c0_13 = arith.constant 0 : index
    %26 = vector.load %arg8[%c16, %c0_13] : memref<72x512xf32, #tpu.memory_space<vmem>>, vector<4x512xf32>
    tpu.vector_store %arg8[%c16, %c0_13], %25 {strides = array<i32>} : memref<72x512xf32, #tpu.memory_space<vmem>>, vector<4x512xf32>,
    %27 = vector.extract_strided_slice %0 {offsets = [0, 511], sizes = [4, 1], strides = [1, 1]} : vector<4x512xf32> to vector<4x1xf32>
    %28 = vector.extract_strided_slice %0 {offsets = [0, 0], sizes = [4, 511], strides = [1, 1]} : vector<4x512xf32> to vector<4x511xf32>
    %29 = tpu.concatenate %27, %28 in 1 : vector<4x1xf32>, vector<4x511xf32> -> vector<4x512xf32>
    %c3 = arith.constant 3 : index
    %c0_14 = arith.constant 0 : index
    %c0_15 = arith.constant 0 : index
    %30 = vector.load %arg6[%c3, %c0_14, %c0_15] : memref<9x1x512xf32, #tpu.memory_space<vmem>>, vector<1x1x512xf32>
    %31 = vector.shape_cast %30 : vector<1x1x512xf32> to vector<1x512xf32>
    %32 = vector.broadcast %31 : vector<1x512xf32> to vector<4x512xf32>
    %33 = arith.mulf %29, %32 : vector<4x512xf32>
    %c24 = arith.constant 24 : index
    %c0_16 = arith.constant 0 : index
    %34 = vector.load %arg8[%c24, %c0_16] : memref<72x512xf32, #tpu.memory_space<vmem>>, vector<4x512xf32>
    tpu.vector_store %arg8[%c24, %c0_16], %33 {strides = array<i32>} : memref<72x512xf32, #tpu.memory_space<vmem>>, vector<4x512xf32>,
    %c4 = arith.constant 4 : index
    %c0_17 = arith.constant 0 : index
    %c0_18 = arith.constant 0 : index
    %35 = vector.load %arg6[%c4, %c0_17, %c0_18] : memref<9x1x512xf32, #tpu.memory_space<vmem>>, vector<1x1x512xf32>
    %36 = vector.shape_cast %35 : vector<1x1x512xf32> to vector<1x512xf32>
    %37 = vector.broadcast %36 : vector<1x512xf32> to vector<4x512xf32>
    %38 = arith.mulf %0, %37 : vector<4x512xf32>
    %c32 = arith.constant 32 : index
    %c0_19 = arith.constant 0 : index
    %39 = vector.load %arg8[%c32, %c0_19] : memref<72x512xf32, #tpu.memory_space<vmem>>, vector<4x512xf32>
    tpu.vector_store %arg8[%c32, %c0_19], %38 {strides = array<i32>} : memref<72x512xf32, #tpu.memory_space<vmem>>, vector<4x512xf32>,
    %40 = vector.extract_strided_slice %0 {offsets = [0, 1], sizes = [4, 511], strides = [1, 1]} : vector<4x512xf32> to vector<4x511xf32>
    %41 = vector.extract_strided_slice %0 {offsets = [0, 0], sizes = [4, 1], strides = [1, 1]} : vector<4x512xf32> to vector<4x1xf32>
    %42 = tpu.concatenate %40, %41 in 1 : vector<4x511xf32>, vector<4x1xf32> -> vector<4x512xf32>
    %c5 = arith.constant 5 : index
    %c0_20 = arith.constant 0 : index
    %c0_21 = arith.constant 0 : index
    %43 = vector.load %arg6[%c5, %c0_20, %c0_21] : memref<9x1x512xf32, #tpu.memory_space<vmem>>, vector<1x1x512xf32>
    %44 = vector.shape_cast %43 : vector<1x1x512xf32> to vector<1x512xf32>
    %45 = vector.broadcast %44 : vector<1x512xf32> to vector<4x512xf32>
    %46 = arith.mulf %42, %45 : vector<4x512xf32>
    %c40 = arith.constant 40 : index
    %c0_22 = arith.constant 0 : index
    %47 = vector.load %arg8[%c40, %c0_22] : memref<72x512xf32, #tpu.memory_space<vmem>>, vector<4x512xf32>
    tpu.vector_store %arg8[%c40, %c0_22], %46 {strides = array<i32>} : memref<72x512xf32, #tpu.memory_space<vmem>>, vector<4x512xf32>,
    %48 = vector.extract_strided_slice %0 {offsets = [0, 15], sizes = [4, 497], strides = [1, 1]} : vector<4x512xf32> to vector<4x497xf32>
    %49 = vector.extract_strided_slice %0 {offsets = [0, 0], sizes = [4, 15], strides = [1, 1]} : vector<4x512xf32> to vector<4x15xf32>
    %50 = tpu.concatenate %48, %49 in 1 : vector<4x497xf32>, vector<4x15xf32> -> vector<4x512xf32>
    %c6 = arith.constant 6 : index
    %c0_23 = arith.constant 0 : index
    %c0_24 = arith.constant 0 : index
    %51 = vector.load %arg6[%c6, %c0_23, %c0_24] : memref<9x1x512xf32, #tpu.memory_space<vmem>>, vector<1x1x512xf32>
    %52 = vector.shape_cast %51 : vector<1x1x512xf32> to vector<1x512xf32>
    %53 = vector.broadcast %52 : vector<1x512xf32> to vector<4x512xf32>
    %54 = arith.mulf %50, %53 : vector<4x512xf32>
    %c48 = arith.constant 48 : index
    %c0_25 = arith.constant 0 : index
    %55 = vector.load %arg8[%c48, %c0_25] : memref<72x512xf32, #tpu.memory_space<vmem>>, vector<4x512xf32>
    tpu.vector_store %arg8[%c48, %c0_25], %54 {strides = array<i32>} : memref<72x512xf32, #tpu.memory_space<vmem>>, vector<4x512xf32>,
    %56 = vector.extract_strided_slice %0 {offsets = [0, 16], sizes = [4, 496], strides = [1, 1]} : vector<4x512xf32> to vector<4x496xf32>
    %57 = vector.extract_strided_slice %0 {offsets = [0, 0], sizes = [4, 16], strides = [1, 1]} : vector<4x512xf32> to vector<4x16xf32>
    %58 = tpu.concatenate %56, %57 in 1 : vector<4x496xf32>, vector<4x16xf32> -> vector<4x512xf32>
    %c7 = arith.constant 7 : index
    %c0_26 = arith.constant 0 : index
    %c0_27 = arith.constant 0 : index
    %59 = vector.load %arg6[%c7, %c0_26, %c0_27] : memref<9x1x512xf32, #tpu.memory_space<vmem>>, vector<1x1x512xf32>
    %60 = vector.shape_cast %59 : vector<1x1x512xf32> to vector<1x512xf32>
    %61 = vector.broadcast %60 : vector<1x512xf32> to vector<4x512xf32>
    %62 = arith.mulf %58, %61 : vector<4x512xf32>
    %c56 = arith.constant 56 : index
    %c0_28 = arith.constant 0 : index
    %63 = vector.load %arg8[%c56, %c0_28] : memref<72x512xf32, #tpu.memory_space<vmem>>, vector<4x512xf32>
    tpu.vector_store %arg8[%c56, %c0_28], %62 {strides = array<i32>} : memref<72x512xf32, #tpu.memory_space<vmem>>, vector<4x512xf32>,
    %64 = vector.extract_strided_slice %0 {offsets = [0, 17], sizes = [4, 495], strides = [1, 1]} : vector<4x512xf32> to vector<4x495xf32>
    %65 = vector.extract_strided_slice %0 {offsets = [0, 0], sizes = [4, 17], strides = [1, 1]} : vector<4x512xf32> to vector<4x17xf32>
    %66 = tpu.concatenate %64, %65 in 1 : vector<4x495xf32>, vector<4x17xf32> -> vector<4x512xf32>
    %c8_29 = arith.constant 8 : index
    %c0_30 = arith.constant 0 : index
    %c0_31 = arith.constant 0 : index
    %67 = vector.load %arg6[%c8_29, %c0_30, %c0_31] : memref<9x1x512xf32, #tpu.memory_space<vmem>>, vector<1x1x512xf32>
    %68 = vector.shape_cast %67 : vector<1x1x512xf32> to vector<1x512xf32>
    %69 = vector.broadcast %68 : vector<1x512xf32> to vector<4x512xf32>
    %70 = arith.mulf %66, %69 : vector<4x512xf32>
    %c64 = arith.constant 64 : index
    %c0_32 = arith.constant 0 : index
    %71 = vector.load %arg8[%c64, %c0_32] : memref<72x512xf32, #tpu.memory_space<vmem>>, vector<4x512xf32>
    tpu.vector_store %arg8[%c64, %c0_32], %70 {strides = array<i32>} : memref<72x512xf32, #tpu.memory_space<vmem>>, vector<4x512xf32>,
    %c0_33 = arith.constant 0 : index
    %c0_34 = arith.constant 0 : index
    %72 = vector.load %arg2[%c0_33, %c0_34] : memref<8x72xf32, #tpu.memory_space<vmem>>, vector<8x72xf32>
    %c0_35 = arith.constant 0 : index
    %c0_36 = arith.constant 0 : index
    %73 = vector.load %arg8[%c0_35, %c0_36] : memref<72x512xf32, #tpu.memory_space<vmem>>, vector<72x512xf32>
    %cst_37 = arith.constant dense<0.000000e+00> : vector<8x512xf32>
    %74 = tpu.matmul %72, %73, %cst_37 {dimension_numbers = #tpu.dot_dimension_numbers<[1], [0], [0], [1], [0, 0, 1, 1], [], []>} : vector<8x72xf32>, vector<72x512xf32>, vector<8x512xf32> -> vector<8x512xf32>
    %c0_38 = arith.constant 0 : index
    %c0_39 = arith.constant 0 : index
    %75 = vector.load %arg3[%c0_38, %c0_39] : memref<8x1xf32, #tpu.memory_space<vmem>>, vector<8x1xf32>
    %76 = vector.broadcast %75 : vector<8x1xf32> to vector<8x512xf32>
    %77 = arith.addf %74, %76 : vector<8x512xf32>
    %78 = vector.extract_strided_slice %77 {offsets = [0, 495], sizes = [8, 17], strides = [1, 1]} : vector<8x512xf32> to vector<8x17xf32>
    %79 = vector.extract_strided_slice %77 {offsets = [0, 0], sizes = [8, 495], strides = [1, 1]} : vector<8x512xf32> to vector<8x495xf32>
    %80 = tpu.concatenate %78, %79 in 1 : vector<8x17xf32>, vector<8x495xf32> -> vector<8x512xf32>
    %c0_40 = arith.constant 0 : index
    %c0_41 = arith.constant 0 : index
    %c0_42 = arith.constant 0 : index
    %81 = vector.load %arg6[%c0_40, %c0_41, %c0_42] : memref<9x1x512xf32, #tpu.memory_space<vmem>>, vector<1x1x512xf32>
    %82 = vector.shape_cast %81 : vector<1x1x512xf32> to vector<1x512xf32>
    %83 = vector.broadcast %82 : vector<1x512xf32> to vector<8x512xf32>
    %84 = arith.mulf %80, %83 : vector<8x512xf32>
    %c0_43 = arith.constant 0 : index
    %c0_44 = arith.constant 0 : index
    %85 = vector.load %arg9[%c0_43, %c0_44] : memref<72x512xf32, #tpu.memory_space<vmem>>, vector<8x512xf32>
    tpu.vector_store %arg9[%c0_43, %c0_44], %84 {strides = array<i32>} : memref<72x512xf32, #tpu.memory_space<vmem>>, vector<8x512xf32>,
    %86 = vector.extract_strided_slice %77 {offsets = [0, 496], sizes = [8, 16], strides = [1, 1]} : vector<8x512xf32> to vector<8x16xf32>
    %87 = vector.extract_strided_slice %77 {offsets = [0, 0], sizes = [8, 496], strides = [1, 1]} : vector<8x512xf32> to vector<8x496xf32>
    %88 = tpu.concatenate %86, %87 in 1 : vector<8x16xf32>, vector<8x496xf32> -> vector<8x512xf32>
    %c1_45 = arith.constant 1 : index
    %c0_46 = arith.constant 0 : index
    %c0_47 = arith.constant 0 : index
    %89 = vector.load %arg6[%c1_45, %c0_46, %c0_47] : memref<9x1x512xf32, #tpu.memory_space<vmem>>, vector<1x1x512xf32>
    %90 = vector.shape_cast %89 : vector<1x1x512xf32> to vector<1x512xf32>
    %91 = vector.broadcast %90 : vector<1x512xf32> to vector<8x512xf32>
    %92 = arith.mulf %88, %91 : vector<8x512xf32>
    %c8_48 = arith.constant 8 : index
    %c0_49 = arith.constant 0 : index
    %93 = vector.load %arg9[%c8_48, %c0_49] : memref<72x512xf32, #tpu.memory_space<vmem>>, vector<8x512xf32>
    tpu.vector_store %arg9[%c8_48, %c0_49], %92 {strides = array<i32>} : memref<72x512xf32, #tpu.memory_space<vmem>>, vector<8x512xf32>,
    %94 = vector.extract_strided_slice %77 {offsets = [0, 497], sizes = [8, 15], strides = [1, 1]} : vector<8x512xf32> to vector<8x15xf32>
    %95 = vector.extract_strided_slice %77 {offsets = [0, 0], sizes = [8, 497], strides = [1, 1]} : vector<8x512xf32> to vector<8x497xf32>
    %96 = tpu.concatenate %94, %95 in 1 : vector<8x15xf32>, vector<8x497xf32> -> vector<8x512xf32>
    %c2_50 = arith.constant 2 : index
    %c0_51 = arith.constant 0 : index
    %c0_52 = arith.constant 0 : index
    %97 = vector.load %arg6[%c2_50, %c0_51, %c0_52] : memref<9x1x512xf32, #tpu.memory_space<vmem>>, vector<1x1x512xf32>
    %98 = vector.shape_cast %97 : vector<1x1x512xf32> to vector<1x512xf32>
    %99 = vector.broadcast %98 : vector<1x512xf32> to vector<8x512xf32>
    %100 = arith.mulf %96, %99 : vector<8x512xf32>
    %c16_53 = arith.constant 16 : index
    %c0_54 = arith.constant 0 : index
    %101 = vector.load %arg9[%c16_53, %c0_54] : memref<72x512xf32, #tpu.memory_space<vmem>>, vector<8x512xf32>
    tpu.vector_store %arg9[%c16_53, %c0_54], %100 {strides = array<i32>} : memref<72x512xf32, #tpu.memory_space<vmem>>, vector<8x512xf32>,
    %102 = vector.extract_strided_slice %77 {offsets = [0, 511], sizes = [8, 1], strides = [1, 1]} : vector<8x512xf32> to vector<8x1xf32>
    %103 = vector.extract_strided_slice %77 {offsets = [0, 0], sizes = [8, 511], strides = [1, 1]} : vector<8x512xf32> to vector<8x511xf32>
    %104 = tpu.concatenate %102, %103 in 1 : vector<8x1xf32>, vector<8x511xf32> -> vector<8x512xf32>
    %c3_55 = arith.constant 3 : index
    %c0_56 = arith.constant 0 : index
    %c0_57 = arith.constant 0 : index
    %105 = vector.load %arg6[%c3_55, %c0_56, %c0_57] : memref<9x1x512xf32, #tpu.memory_space<vmem>>, vector<1x1x512xf32>
    %106 = vector.shape_cast %105 : vector<1x1x512xf32> to vector<1x512xf32>
    %107 = vector.broadcast %106 : vector<1x512xf32> to vector<8x512xf32>
    %108 = arith.mulf %104, %107 : vector<8x512xf32>
    %c24_58 = arith.constant 24 : index
    %c0_59 = arith.constant 0 : index
    %109 = vector.load %arg9[%c24_58, %c0_59] : memref<72x512xf32, #tpu.memory_space<vmem>>, vector<8x512xf32>
    tpu.vector_store %arg9[%c24_58, %c0_59], %108 {strides = array<i32>} : memref<72x512xf32, #tpu.memory_space<vmem>>, vector<8x512xf32>,
    %c4_60 = arith.constant 4 : index
    %c0_61 = arith.constant 0 : index
    %c0_62 = arith.constant 0 : index
    %110 = vector.load %arg6[%c4_60, %c0_61, %c0_62] : memref<9x1x512xf32, #tpu.memory_space<vmem>>, vector<1x1x512xf32>
    %111 = vector.shape_cast %110 : vector<1x1x512xf32> to vector<1x512xf32>
    %112 = vector.broadcast %111 : vector<1x512xf32> to vector<8x512xf32>
    %113 = arith.mulf %77, %112 : vector<8x512xf32>
    %c32_63 = arith.constant 32 : index
    %c0_64 = arith.constant 0 : index
    %114 = vector.load %arg9[%c32_63, %c0_64] : memref<72x512xf32, #tpu.memory_space<vmem>>, vector<8x512xf32>
    tpu.vector_store %arg9[%c32_63, %c0_64], %113 {strides = array<i32>} : memref<72x512xf32, #tpu.memory_space<vmem>>, vector<8x512xf32>,
    %115 = vector.extract_strided_slice %77 {offsets = [0, 1], sizes = [8, 511], strides = [1, 1]} : vector<8x512xf32> to vector<8x511xf32>
    %116 = vector.extract_strided_slice %77 {offsets = [0, 0], sizes = [8, 1], strides = [1, 1]} : vector<8x512xf32> to vector<8x1xf32>
    %117 = tpu.concatenate %115, %116 in 1 : vector<8x511xf32>, vector<8x1xf32> -> vector<8x512xf32>
    %c5_65 = arith.constant 5 : index
    %c0_66 = arith.constant 0 : index
    %c0_67 = arith.constant 0 : index
    %118 = vector.load %arg6[%c5_65, %c0_66, %c0_67] : memref<9x1x512xf32, #tpu.memory_space<vmem>>, vector<1x1x512xf32>
    %119 = vector.shape_cast %118 : vector<1x1x512xf32> to vector<1x512xf32>
    %120 = vector.broadcast %119 : vector<1x512xf32> to vector<8x512xf32>
    %121 = arith.mulf %117, %120 : vector<8x512xf32>
    %c40_68 = arith.constant 40 : index
    %c0_69 = arith.constant 0 : index
    %122 = vector.load %arg9[%c40_68, %c0_69] : memref<72x512xf32, #tpu.memory_space<vmem>>, vector<8x512xf32>
    tpu.vector_store %arg9[%c40_68, %c0_69], %121 {strides = array<i32>} : memref<72x512xf32, #tpu.memory_space<vmem>>, vector<8x512xf32>,
    %123 = vector.extract_strided_slice %77 {offsets = [0, 15], sizes = [8, 497], strides = [1, 1]} : vector<8x512xf32> to vector<8x497xf32>
    %124 = vector.extract_strided_slice %77 {offsets = [0, 0], sizes = [8, 15], strides = [1, 1]} : vector<8x512xf32> to vector<8x15xf32>
    %125 = tpu.concatenate %123, %124 in 1 : vector<8x497xf32>, vector<8x15xf32> -> vector<8x512xf32>
    %c6_70 = arith.constant 6 : index
    %c0_71 = arith.constant 0 : index
    %c0_72 = arith.constant 0 : index
    %126 = vector.load %arg6[%c6_70, %c0_71, %c0_72] : memref<9x1x512xf32, #tpu.memory_space<vmem>>, vector<1x1x512xf32>
    %127 = vector.shape_cast %126 : vector<1x1x512xf32> to vector<1x512xf32>
    %128 = vector.broadcast %127 : vector<1x512xf32> to vector<8x512xf32>
    %129 = arith.mulf %125, %128 : vector<8x512xf32>
    %c48_73 = arith.constant 48 : index
    %c0_74 = arith.constant 0 : index
    %130 = vector.load %arg9[%c48_73, %c0_74] : memref<72x512xf32, #tpu.memory_space<vmem>>, vector<8x512xf32>
    tpu.vector_store %arg9[%c48_73, %c0_74], %129 {strides = array<i32>} : memref<72x512xf32, #tpu.memory_space<vmem>>, vector<8x512xf32>,
    %131 = vector.extract_strided_slice %77 {offsets = [0, 16], sizes = [8, 496], strides = [1, 1]} : vector<8x512xf32> to vector<8x496xf32>
    %132 = vector.extract_strided_slice %77 {offsets = [0, 0], sizes = [8, 16], strides = [1, 1]} : vector<8x512xf32> to vector<8x16xf32>
    %133 = tpu.concatenate %131, %132 in 1 : vector<8x496xf32>, vector<8x16xf32> -> vector<8x512xf32>
    %c7_75 = arith.constant 7 : index
    %c0_76 = arith.constant 0 : index
    %c0_77 = arith.constant 0 : index
    %134 = vector.load %arg6[%c7_75, %c0_76, %c0_77] : memref<9x1x512xf32, #tpu.memory_space<vmem>>, vector<1x1x512xf32>
    %135 = vector.shape_cast %134 : vector<1x1x512xf32> to vector<1x512xf32>
    %136 = vector.broadcast %135 : vector<1x512xf32> to vector<8x512xf32>
    %137 = arith.mulf %133, %136 : vector<8x512xf32>
    %c56_78 = arith.constant 56 : index
    %c0_79 = arith.constant 0 : index
    %138 = vector.load %arg9[%c56_78, %c0_79] : memref<72x512xf32, #tpu.memory_space<vmem>>, vector<8x512xf32>
    tpu.vector_store %arg9[%c56_78, %c0_79], %137 {strides = array<i32>} : memref<72x512xf32, #tpu.memory_space<vmem>>, vector<8x512xf32>,
    %139 = vector.extract_strided_slice %77 {offsets = [0, 17], sizes = [8, 495], strides = [1, 1]} : vector<8x512xf32> to vector<8x495xf32>
    %140 = vector.extract_strided_slice %77 {offsets = [0, 0], sizes = [8, 17], strides = [1, 1]} : vector<8x512xf32> to vector<8x17xf32>
    %141 = tpu.concatenate %139, %140 in 1 : vector<8x495xf32>, vector<8x17xf32> -> vector<8x512xf32>
    %c8_80 = arith.constant 8 : index
    %c0_81 = arith.constant 0 : index
    %c0_82 = arith.constant 0 : index
    %142 = vector.load %arg6[%c8_80, %c0_81, %c0_82] : memref<9x1x512xf32, #tpu.memory_space<vmem>>, vector<1x1x512xf32>
    %143 = vector.shape_cast %142 : vector<1x1x512xf32> to vector<1x512xf32>
    %144 = vector.broadcast %143 : vector<1x512xf32> to vector<8x512xf32>
    %145 = arith.mulf %141, %144 : vector<8x512xf32>
    %c64_83 = arith.constant 64 : index
    %c0_84 = arith.constant 0 : index
    %146 = vector.load %arg9[%c64_83, %c0_84] : memref<72x512xf32, #tpu.memory_space<vmem>>, vector<8x512xf32>
    tpu.vector_store %arg9[%c64_83, %c0_84], %145 {strides = array<i32>} : memref<72x512xf32, #tpu.memory_space<vmem>>, vector<8x512xf32>,
    %c0_85 = arith.constant 0 : index
    %c0_86 = arith.constant 0 : index
    %147 = vector.load %arg4[%c0_85, %c0_86] : memref<4x72xf32, #tpu.memory_space<vmem>>, vector<4x72xf32>
    %c0_87 = arith.constant 0 : index
    %c0_88 = arith.constant 0 : index
    %148 = vector.load %arg9[%c0_87, %c0_88] : memref<72x512xf32, #tpu.memory_space<vmem>>, vector<72x512xf32>
    %cst_89 = arith.constant dense<0.000000e+00> : vector<4x512xf32>
    %149 = tpu.matmul %147, %148, %cst_89 {dimension_numbers = #tpu.dot_dimension_numbers<[1], [0], [0], [1], [0, 0, 1, 1], [], []>} : vector<4x72xf32>, vector<72x512xf32>, vector<4x512xf32> -> vector<4x512xf32>
    %c0_90 = arith.constant 0 : index
    %c0_91 = arith.constant 0 : index
    %150 = vector.load %arg5[%c0_90, %c0_91] : memref<4x1xf32, #tpu.memory_space<vmem>>, vector<4x1xf32>
    %151 = vector.broadcast %150 : vector<4x1xf32> to vector<4x512xf32>
    %152 = arith.addf %149, %151 : vector<4x512xf32>
    %c0_92 = arith.constant 0 : index
    %c0_93 = arith.constant 0 : index
    %153 = vector.load %arg7[%c0_92, %c0_93] : memref<4x512xf32, #tpu.memory_space<vmem>>, vector<4x512xf32>
    tpu.vector_store %arg7[%c0_92, %c0_93], %152 {strides = array<i32>} : memref<4x512xf32, #tpu.memory_space<vmem>>, vector<4x512xf32>,
    return
  }
  func.func @transform_0(%arg0: i32) -> (i32, i32) {
    %c0_i32 = arith.constant 0 : i32
    %c0_i32_0 = arith.constant 0 : i32
    return %c0_i32, %arg0 : i32, i32
  }
  func.func @transform_1(%arg0: i32) -> (i32, i32) {
    %c0_i32 = arith.constant 0 : i32
    %c0_i32_0 = arith.constant 0 : i32
    %c0_i32_1 = arith.constant 0 : i32
    return %c0_i32, %c0_i32_0 : i32, i32
  }
  func.func @transform_2(%arg0: i32) -> (i32, i32) {
    %c0_i32 = arith.constant 0 : i32
    %c0_i32_0 = arith.constant 0 : i32
    %c0_i32_1 = arith.constant 0 : i32
    return %c0_i32, %c0_i32_0 : i32, i32
  }
  func.func @transform_3(%arg0: i32) -> (i32, i32) {
    %c0_i32 = arith.constant 0 : i32
    %c0_i32_0 = arith.constant 0 : i32
    %c0_i32_1 = arith.constant 0 : i32
    return %c0_i32, %c0_i32_0 : i32, i32
  }
  func.func @transform_4(%arg0: i32) -> (i32, i32) {
    %c0_i32 = arith.constant 0 : i32
    %c0_i32_0 = arith.constant 0 : i32
    %c0_i32_1 = arith.constant 0 : i32
    return %c0_i32, %c0_i32_0 : i32, i32
  }
  func.func @transform_5(%arg0: i32) -> (i32, i32, i32) {
    %c0_i32 = arith.constant 0 : i32
    %c0_i32_0 = arith.constant 0 : i32
    %c0_i32_1 = arith.constant 0 : i32
    %c0_i32_2 = arith.constant 0 : i32
    return %c0_i32, %c0_i32_0, %c0_i32_1 : i32, i32, i32
  }
  func.func @transform_6(%arg0: i32) -> (i32, i32) {
    %c0_i32 = arith.constant 0 : i32
    %c0_i32_0 = arith.constant 0 : i32
    return %c0_i32, %arg0 : i32, i32
  }
}

</mosaic_0001>

<bundles_post_ra>
// kernel: tpu_custom_call.1
= control target key start
LH: loop header
LB: loop body
LE: loop exit
PB: predicated region body
PF: predicated region fallthrough
CT: control target
= control target key end

     0   :  { %11 = vsyncpa [#allocation5], 0  ;;  %s1934_s0 = inlined_call_operand.hbm [shape: f32[4,512], index: 0, kind: input, shape index: {}]   ;;  %s1935_s1 = inlined_call_operand.vmem [shape: f32[8,72], index: 1, kind: input, shape index: {}]   ;;  %s1936_s2 = inlined_call_operand.vmem [shape: f32[8,1], index: 2, kind: input, shape index: {}]   ;;  %s1937_s3 = inlined_call_operand.vmem [shape: f32[4,72], index: 3, kind: input, shape index: {}]   ;;  %s1938_s4 = inlined_call_operand.vmem [shape: f32[4,1], index: 4, kind: input, shape index: {}]   ;;  %s1939_s5 = inlined_call_operand.hbm [shape: f32[9,1,512], index: 5, kind: input, shape index: {}]   ;;  %s1940_s6 = inlined_call_operand.hbm [shape: f32[4,512], index: 6, kind: output, shape index: {}]  }
   0x1   :  { %12 = vsyncpa [#allocation8], 0 }
   0x2   :  { %13 = vsyncpa [#allocation6], 0  ;;  %s1489_s21 = smov [#allocation4]   ;;  %s1490_s23 = smov [#allocation7]  }
   0x3   :  { %s20_s22 = sshll.u32 %s1489_s21, 4  ;;  %s37_s24 = sshll.u32 %s1490_s23, 4  ;;  %s21_s22 = int_to_ptr.vmem [resolvable:$true] %s20_s22  ;;  %s1539_s24 = int_to_ptr.vmem [resolvable:$true] %s37_s24 }
   0x4   :  { %s1417_s27 = scalar_lea.hbm %s1934_s0, 256 }
   0x5   :  { %p1418_p0 = scmp.ne.s32.totalorder %s1934_s0, %s1417_s27  ;;  %p1421_p1 = scmp.lt.u32.totalorder %s1417_s27, %s1934_s0 }
   0x7   :  { %p1423_p2 = pnand %p1421_p1, %p1418_p0 }
   0x9   :  { %1426 = shalt.err (!%p1423_p2)
}
   0xa   :  { %s1427_s8 = scalar_lea.vmem %s21_s22, 256  ;;  %p1432_p4 = scmp.lt.s32.totalorder %s21_s22, %s21_s22 }
   0xb   :  { %p1428_p3 = scmp.ne.s32.totalorder %s21_s22, %s1427_s8  ;;  %p1433_p5 = scmp.lt.s32.totalorder %s1427_s8, %s1427_s8 }
   0xd   :  { %p1434_p6 = por %p1433_p5, %p1432_p4 }
   0xf   :  { %p1435_p7 = pnand %p1434_p6, %p1428_p3 }
  0x11   :  { %1438 = shalt.err (!%p1435_p7)
}
  0x12   :  { %23 = dma.hbm_to_vmem [thread:$0]  %s1934_s0, 256, %s21_s22, [#allocation5]  }
  0x13   :  { %s1439_s13 = scalar_lea.hbm %s1939_s5, 576 }
  0x14   :  { %p1440_p8 = scmp.ne.s32.totalorder %s1939_s5, %s1439_s13  ;;  %p1443_p9 = scmp.lt.u32.totalorder %s1439_s13, %s1939_s5 }
  0x16   :  { %p1445_p10 = pnand %p1443_p9, %p1440_p8 }
  0x18   :  { %1448 = shalt.err (!%p1445_p10)
}
  0x19   :  { %s1449_s18 = scalar_lea.vmem %s1539_s24, 576  ;;  %p1454_p12 = scmp.lt.s32.totalorder %s1539_s24, %s1539_s24 }
  0x1a   :  { %p1450_p11 = scmp.ne.s32.totalorder %s1539_s24, %s1449_s18  ;;  %p1455_p13 = scmp.lt.s32.totalorder %s1449_s18, %s1449_s18 }
  0x1c   :  { %p1456_p0 = por %p1455_p13, %p1454_p12 }
  0x1e   :  { %p1457_p1 = pnand %p1456_p0, %p1450_p11 }
  0x20   :  { %1460 = shalt.err (!%p1457_p1)
}
  0x21   :  { %s1491_s0 = smov 64   ;;  %s1492_s19 = smov 4  }
  0x22   :  { %43 = dma.hbm_to_vmem [thread:$0]  %s1939_s5, 576, %s1539_s24, [#allocation8], %s1491_s0, %s1491_s0, %s1492_s19  }
  0x23   :  { %1483 = dma.done.wait [#allocation5], 256  }
  0x24   :  { %1484 = vsyncadd [#allocation5], 4294967040 }
  0x25   :  { %1485 = dma.done.wait [#allocation8], 576  }
  0x26   :  { %1486 = vsyncadd [#allocation8], 4294966720  ;;  %v1493_v0 = vmov 0.0   ;;  %v51_v1 = vld [vmem:[#allocation4 + $0x8] sm:$0xff]  ;;  %v50_v2 = vld [vmem:[#allocation4] sm:$0xff]  ;;  %s1494_s5 = smov 17   ;;  %v112_v5 = vlaneseq }
  0x27   :  { %52 = vst [vmem:[#allocation2] sm:$0xff] %v1493_v0  ;;  %55 = vst [vmem:[#allocation2 + $0x18] sm:$0xff] %v1493_v0  ;;  %629 = vmatprep.mubr.f32.mxu0 %v1493_v0  ;;  %700 = vmatprep.mubr.f32.mxu1 %v1493_v0  ;;  %v89_v3 = vcombine.high %v51_v1, %v51_v1  ;;  %s1495_s22 = smov 16   ;;  %v94_v4 = vcombine.high %v50_v2, %v50_v2  ;;  %v288_v9 = vld [vmem:[#allocation7 + $0x10] sm:$0xf]  ;;  %s1496_s23 = smov 15  }
  0x28   :  { %53 = vst [vmem:[#allocation2 + $0x8] sm:$0xff] %v1493_v0  ;;  %54 = vst [vmem:[#allocation2 + $0x10] sm:$0xff] %v1493_v0  ;;  %99 = vrot.lane.b32.xlu1 %v51_v1, %s1494_s5  ;;  %95 = vrot.lane.b32.xlu0 %v50_v2, %s1494_s5  ;;  %v113_v6 = vshrl.u32 %v112_v5, 7  ;;  %s1497_s24 = smov 1   ;;  %s1498_s25 = smov 127   ;;  %v1502_v22 = vmov 0  }
  0x29   :  { %56 = vst [vmem:[#allocation2 + $0x20] sm:$0xff] %v1493_v0  ;;  %57 = vst [vmem:[#allocation2 + $0x28] sm:$0xff] %v1493_v0  ;;  %s1499_s26 = smov 113   ;;  %s1500_s27 = smov 112   ;;  %1414 = vset.pattern.permute.xlu0 %v1502_v22  ;;  %v555_v23 = vld [vmem:[%s1936_s2] sm:$0xff]  ;;  %vm101_vm0 = vcmask 138240  }
  0x2a   :  { %58 = vst [vmem:[#allocation2 + $0x30] sm:$0xff] %v1493_v0  ;;  %59 = vst [vmem:[#allocation2 + $0x38] sm:$0xff] %v1493_v0  ;;  %v1616_v7 = vsub.s32 0, %v113_v6  ;;  %v1618_v8 = vsub.s32 1, %v113_v6  ;;  %v1622_v10 = vsub.s32 2, %v113_v6  ;;  %v1626_v13 = vsub.s32 3, %v113_v6 }
  0x2b   :  { %60 = vst [vmem:[#allocation2 + $0x40] sm:$0xff] %v1493_v0  ;;  %61 = vst [vmem:[#allocation2 + $0x48] sm:$0xff] %v1493_v0  ;;  %s1501_s28 = smov 111   ;;  %v110_v24 = vld [vmem:[#allocation7] sm:$0xf]  ;;  %vm149_vm1 = vcmask 130048  }
  0x2c   :  { %62 = vst [vmem:[#allocation2 + $0x50] sm:$0xff] %v1493_v0  ;;  %63 = vst [vmem:[#allocation2 + $0x58] sm:$0xff] %v1493_v0  ;;  %143 = vrot.lane.b32.xlu1 %v50_v2, %s1495_s22  ;;  %90 = vrot.lane.b32.xlu0 %v89_v3, %s1494_s5  ;;  %v293_v11 = vrot.slane %v288_v9, %v1616_v7  ;;  %v297_v12 = vrot.slane %v288_v9, %v1618_v8  ;;  %v159_v29 = vld [vmem:[#allocation7 + $0x4] sm:$0xf]  ;;  %v208_v50 = vld [vmem:[#allocation7 + $0x8] sm:$0xf] }
  0x2d   :  { %64 = vst [vmem:[#allocation2 + $0x60] sm:$0xff] %v1493_v0  ;;  %65 = vst [vmem:[#allocation2 + $0x68] sm:$0xff] %v1493_v0  ;;  %v301_v15 = vrot.slane %v288_v9, %v1622_v10  ;;  %v305_v16 = vrot.slane %v288_v9, %v1626_v13  ;;  %v115_v27 = vrot.slane %v110_v24, %v1616_v7  ;;  %vm198_vm2 = vcmask 121856  }
  0x2e   :  { %66 = vst [vmem:[#allocation2 + $0x70] sm:$0xff] %v1493_v0  ;;  %67 = vst [vmem:[#allocation2 + $0x78] sm:$0xff] %v1493_v0  ;;  %v306_v14 = vcombine.low %v293_v11, %v297_v12  ;;  %v127_v28 = vrot.slane %v110_v24, %v1626_v13  ;;  %v164_v34 = vrot.slane %v159_v29, %v1616_v7  ;;  %vm247_vm3 = vcmask 7168  }
  0x2f   :  { %68 = vst [vmem:[#allocation2 + $0x80] sm:$0xff] %v1493_v0  ;;  %69 = vst [vmem:[#allocation2 + $0x88] sm:$0xff] %v1493_v0  ;;  %v307_v18 = vcombine.low %v301_v15, %v305_v16  ;;  %v119_v37 = vrot.slane %v110_v24, %v1618_v8  ;;  %v123_v38 = vrot.slane %v110_v24, %v1622_v10  ;;  %vm330_vm4 = vcmask 1039360  }
  0x30   :  { %70 = vst [vmem:[#allocation2 + $0x90] sm:$0xff] %v1493_v0  ;;  %71 = vst [vmem:[#allocation2 + $0x98] sm:$0xff] %v1493_v0  ;;  %140 = vrot.lane.b32.xlu0 %v89_v3, %s1495_s22  ;;  %97 = vrot.lane.b32.xlu1 %v94_v4, %s1494_s5  ;;  %v310_v17 = vmul.f32 %v306_v14, %v50_v2  ;;  %v168_v41 = vrot.slane %v159_v29, %v1618_v8  ;;  %vm379_vm5 = vcmask 924672   ;;  %vm428_vm6 = vcmask 916480  }
  0x31   :  { %72 = vst [vmem:[#allocation2 + $0xa0] sm:$0xff] %v1493_v0  ;;  %73 = vst [vmem:[#allocation2 + $0xa8] sm:$0xff] %v1493_v0  ;;  %v311_v19 = vmul.f32 %v307_v18, %v51_v1  ;;  %v172_v45 = vrot.slane %v159_v29, %v1622_v10  ;;  %v176_v49 = vrot.slane %v159_v29, %v1626_v13  ;;  %vm477_vm7 = vcmask 908288  }
  0x32   :  { %74 = vst [vmem:[#allocation2 + $0xb0] sm:$0xff] %v1493_v0  ;;  %75 = vst [vmem:[#allocation2 + $0xb8] sm:$0xff] %v1493_v0  ;;  %v314_v20 = vcombine.high %v310_v17, %v310_v17  ;;  %v213_v59 = vrot.slane %v208_v50, %v1616_v7  ;;  %vm561_vm8 = vcmask 588800  }
  0x33   :  { %76 = vst [vmem:[#allocation2 + $0xc0] sm:$0xff] %v1493_v0  ;;  %77 = vst [vmem:[#allocation2 + $0xc8] sm:$0xff] %v1493_v0  ;;  %v315_v21 = vcombine.high %v311_v19, %v311_v19 }
  0x34   :  { %78 = vst [vmem:[#allocation2 + $0xd0] sm:$0xff] %v1493_v0  ;;  %79 = vst [vmem:[#allocation2 + $0xd8] sm:$0xff] %v1493_v0  ;;  %145 = vrot.lane.b32.xlu0 %v94_v4, %s1495_s22  ;;  %147 = vrot.lane.b32.xlu1 %v51_v1, %s1495_s22 }
  0x35   :  { %80 = vst [vmem:[#allocation2 + $0xe0] sm:$0xff] %v1493_v0  ;;  %81 = vst [vmem:[#allocation2 + $0xe8] sm:$0xff] %v1493_v0 }
  0x36   :  { %82 = vst [vmem:[#allocation2 + $0xf0] sm:$0xff] %v1493_v0  ;;  %83 = vst [vmem:[#allocation2 + $0xf8] sm:$0xff] %v1493_v0 }
  0x37   :  { %84 = vst [vmem:[#allocation2 + $0x100] sm:$0xff] %v1493_v0  ;;  %85 = vst [vmem:[#allocation2 + $0x108] sm:$0xff] %v1493_v0 }
  0x38   :  { %86 = vst [vmem:[#allocation2 + $0x110] sm:$0xff] %v1493_v0  ;;  %87 = vst [vmem:[#allocation2 + $0x118] sm:$0xff] %v1493_v0  ;;  %189 = vrot.lane.b32.xlu0 %v89_v3, %s1496_s23  ;;  %192 = vrot.lane.b32.xlu1 %v50_v2, %s1496_s23 }
  0x39   :  { %318 = vst [vmem:[#allocation2 + $0x80] sm:$0xf] %v310_v17  ;;  %320 = vst [vmem:[#allocation2 + $0x90] sm:$0xf] %v311_v19 }
  0x3a   :  { %319 = vst [vmem:[#allocation2 + $0x88] sm:$0xf] %v314_v20  ;;  %321 = vst [vmem:[#allocation2 + $0x98] sm:$0xf] %v315_v21 }
  0x3c   :  { %194 = vrot.lane.b32.xlu0 %v94_v4, %s1496_s23  ;;  %196 = vrot.lane.b32.xlu1 %v51_v1, %s1496_s23 }
  0x40   :  { %238 = vrot.lane.b32.xlu0 %v89_v3, %s1497_s24  ;;  %241 = vrot.lane.b32.xlu1 %v50_v2, %s1497_s24 }
  0x44   :  { %243 = vrot.lane.b32.xlu0 %v94_v4, %s1497_s24  ;;  %245 = vrot.lane.b32.xlu1 %v51_v1, %s1497_s24 }
  0x48   :  { %322 = vrot.lane.b32.xlu0 %v50_v2, %s1498_s25  ;;  %324 = vrot.lane.b32.xlu1 %v94_v4, %s1498_s25 }
  0x4c   :  { %326 = vrot.lane.b32.xlu0 %v51_v1, %s1498_s25  ;;  %328 = vrot.lane.b32.xlu1 %v89_v3, %s1498_s25 }
  0x50   :  { %371 = vrot.lane.b32.xlu0 %v50_v2, %s1499_s26  ;;  %373 = vrot.lane.b32.xlu1 %v94_v4, %s1499_s26 }
  0x54   :  { %375 = vrot.lane.b32.xlu0 %v51_v1, %s1499_s26  ;;  %377 = vrot.lane.b32.xlu1 %v89_v3, %s1499_s26 }
  0x58   :  { %420 = vrot.lane.b32.xlu0 %v50_v2, %s1500_s27  ;;  %422 = vrot.lane.b32.xlu1 %v94_v4, %s1500_s27 }
  0x5c   :  { %424 = vrot.lane.b32.xlu0 %v51_v1, %s1500_s27  ;;  %426 = vrot.lane.b32.xlu1 %v89_v3, %s1500_s27 }
  0x60   :  { %469 = vrot.lane.b32.xlu0 %v50_v2, %s1501_s28  ;;  %471 = vrot.lane.b32.xlu1 %v94_v4, %s1501_s28  ;;  %v221_v2 = vrot.slane %v208_v50, %v1622_v10  ;;  %v257_v4 = vld [vmem:[#allocation7 + $0xc] sm:$0xf] }
  0x61   :  { %v262_v18 = vrot.slane %v257_v4, %v1616_v7 }
  0x64   :  { %473 = vrot.lane.b32.xlu0 %v51_v1, %s1501_s28  ;;  %475 = vrot.lane.b32.xlu1 %v89_v3, %s1501_s28  ;;  %v217_v1 = vrot.slane %v208_v50, %v1618_v8  ;;  %v225_v3 = vrot.slane %v208_v50, %v1626_v13 }
  0x68   :  { %558 = vperm.xlu0 %1414, %v555_v23  }
  0x9a   :  { %v100_v25 = vpop.permute.xlu1 %99  ;;  %v96_v26 = vpop.permute.xlu0 %95 }
  0x9e   :  { %v144_v30 = vpop.permute.xlu1 %143  ;;  %v91_v31 = vpop.permute.xlu0 %90 }
  0x9f   :  { %v104_v32 = vsel %vm101_vm0, %v100_v25, %v91_v31  ;;  %v109_v33 = vsel %vm101_vm0, %v91_v31, %v96_v26 }
  0xa0   :  { %v132_v35 = vmul.f32 %v115_v27, %v109_v33  ;;  %v135_v36 = vmul.f32 %v127_v28, %v104_v32  ;;  %v266_v33 = vrot.slane %v257_v4, %v1618_v8 }
  0xa2   :  { %136 = vst [vmem:[#allocation2] sm:$0xf] %v132_v35  ;;  %139 = vst [vmem:[#allocation2 + $0x18] sm:$0xf] %v135_v36  ;;  %v141_v39 = vpop.permute.xlu0 %140  ;;  %v98_v40 = vpop.permute.xlu1 %97  ;;  %v270_v35 = vrot.slane %v257_v4, %v1622_v10  ;;  %v274_v36 = vrot.slane %v257_v4, %v1626_v13 }
  0xa3   :  { %v157_v42 = vsel %vm149_vm1, %v141_v39, %v144_v30  ;;  %v102_v43 = vsel %vm101_vm0, %v96_v26, %v98_v40  ;;  %v103_v44 = vsel %vm101_vm0, %v98_v40, %v100_v25 }
  0xa4   :  { %v181_v46 = vmul.f32 %v164_v34, %v157_v42  ;;  %v133_v47 = vmul.f32 %v119_v37, %v102_v43  ;;  %v134_v48 = vmul.f32 %v123_v38, %v103_v44  ;;  %v341_v37 = vld [vmem:[#allocation7 + $0x14] sm:$0xf] }
  0xa6   :  { %185 = vst [vmem:[#allocation2 + $0x20] sm:$0xf] %v181_v46  ;;  %137 = vst [vmem:[#allocation2 + $0x8] sm:$0xf] %v133_v47  ;;  %v146_v51 = vpop.permute.xlu0 %145  ;;  %v148_v52 = vpop.permute.xlu1 %147  ;;  %v346_v46 = vrot.slane %v341_v37, %v1616_v7 }
  0xa7   :  { %138 = vst [vmem:[#allocation2 + $0x10] sm:$0xf] %v134_v48  ;;  %v150_v53 = vsel %vm149_vm1, %v144_v30, %v146_v51  ;;  %v151_v54 = vsel %vm149_vm1, %v146_v51, %v148_v52  ;;  %v152_v55 = vsel %vm149_vm1, %v148_v52, %v141_v39  ;;  %v350_v51 = vrot.slane %v341_v37, %v1618_v8 }
  0xa8   :  { %v182_v56 = vmul.f32 %v168_v41, %v150_v53  ;;  %v183_v57 = vmul.f32 %v172_v45, %v151_v54  ;;  %v184_v58 = vmul.f32 %v176_v49, %v152_v55  ;;  %v354_v52 = vrot.slane %v341_v37, %v1622_v10  ;;  %v390_v54 = vld [vmem:[#allocation7 + $0x18] sm:$0xf] }
  0xa9   :  { %v522_v14 = vld [vmem:[#allocation2 + $0x18] sm:$0xff]  ;;  %v519_v29 = vld [vmem:[#allocation2] sm:$0xff]  ;;  %v358_v53 = vrot.slane %v341_v37, %v1626_v13 }
  0xaa   :  { %186 = vst [vmem:[#allocation2 + $0x28] sm:$0xf] %v182_v56  ;;  %187 = vst [vmem:[#allocation2 + $0x30] sm:$0xf] %v183_v57  ;;  %v190_v60 = vpop.permute.xlu0 %189  ;;  %v193_v61 = vpop.permute.xlu1 %192  ;;  %v535_v37 = vld [vmem:[#allocation2 + $0x80] sm:$0xff] }
  0xab   :  { %188 = vst [vmem:[#allocation2 + $0x38] sm:$0xf] %v184_v58  ;;  %v206_v62 = vsel %vm198_vm2, %v190_v60, %v193_v61 }
  0xac   :  { %v230_v63 = vmul.f32 %v213_v59, %v206_v62 }
  0xad   :  { %v520_v19 = vld [vmem:[#allocation2 + $0x8] sm:$0xff]  ;;  %v523_v20 = vld [vmem:[#allocation2 + $0x20] sm:$0xff] }
  0xae   :  { %234 = vst [vmem:[#allocation2 + $0x40] sm:$0xf] %v230_v63  ;;  %v195_v5 = vpop.permute.xlu0 %194  ;;  %v197_v6 = vpop.permute.xlu1 %196  ;;  %v521_v21 = vld [vmem:[#allocation2 + $0x10] sm:$0xff]  ;;  %v1337_v32 = vpack.c.bf16 %v523_v20, %v519_v29  ;;  %v399_v20 = vrot.slane %v390_v54, %v1618_v8 }
  0xaf   :  { %v199_v9 = vsel %vm198_vm2, %v193_v61, %v195_v5  ;;  %v200_v11 = vsel %vm198_vm2, %v195_v5, %v197_v6  ;;  %v201_v12 = vsel %vm198_vm2, %v197_v6, %v190_v60 }
  0xb0   :  { %v231_v15 = vmul.f32 %v217_v1, %v199_v9  ;;  %v232_v16 = vmul.f32 %v221_v2, %v200_v11  ;;  %v233_v17 = vmul.f32 %v225_v3, %v201_v12  ;;  %v395_v1 = vrot.slane %v390_v54, %v1616_v7 }
  0xb1   :  { %v524_v22 = vld [vmem:[#allocation2 + $0x28] sm:$0xff]  ;;  %v525_v24 = vld [vmem:[#allocation2 + $0x30] sm:$0xff] }
  0xb2   :  { %v526_v23 = vld [vmem:[#allocation2 + $0x38] sm:$0xff]  ;;  %235 = vst [vmem:[#allocation2 + $0x48] sm:$0xf] %v231_v15  ;;  %236 = vst [vmem:[#allocation2 + $0x50] sm:$0xf] %v232_v16  ;;  %v239_v25 = vpop.permute.xlu0 %238  ;;  %v242_v26 = vpop.permute.xlu1 %241  ;;  %v1335_v27 = vpack.c.bf16 %v524_v22, %v520_v19  ;;  %v1353_v30 = vpack.c.bf16 %v525_v24, %v521_v21  ;;  %v403_v22 = vrot.slane %v390_v54, %v1622_v10 }
  0xb3   :  { %237 = vst [vmem:[#allocation2 + $0x58] sm:$0xf] %v233_v17  ;;  %v1351_v28 = vpack.c.bf16 %v526_v23, %v522_v14  ;;  %v255_v31 = vsel %vm247_vm3, %v239_v25, %v242_v26  ;;  %v407_v23 = vrot.slane %v390_v54, %v1626_v13  ;;  %v439_v24 = vld [vmem:[#allocation7 + $0x1c] sm:$0xf] }
  0xb4   :  { %v279_v34 = vmul.f32 %v262_v18, %v255_v31  ;;  %1336 = vmatprep.subr.bf16.mxu0 %v1335_v27  ;;  %v538_v31 = vld [vmem:[#allocation2 + $0x98] sm:$0xff] }
  0xb5   :  { %1352 = vmatprep.subr.bf16.mxu1 %v1351_v28  ;;  %1338 = vmatpush1.bf16.msra.mxu0 %v1337_v32  ;;  %v527_v16 = vld [vmem:[#allocation2 + $0x40] sm:$0xff]  ;;  %v537_v32 = vld [vmem:[#allocation2 + $0x90] sm:$0xff] }
  0xb6   :  { %1354 = vmatpush1.bf16.msra.mxu1 %v1353_v30  ;;  %283 = vst [vmem:[#allocation2 + $0x60] sm:$0xf] %v279_v34  ;;  %v244_v38 = vpop.permute.xlu0 %243  ;;  %v246_v39 = vpop.permute.xlu1 %245  ;;  %v536_v30 = vld [vmem:[#allocation2 + $0x88] sm:$0xff] }
  0xb7   :  { %v248_v40 = vsel %vm247_vm3, %v242_v26, %v244_v38  ;;  %v249_v41 = vsel %vm247_vm3, %v244_v38, %v246_v39  ;;  %v250_v42 = vsel %vm247_vm3, %v246_v39, %v239_v25 }
  0xb8   :  { %v280_v43 = vmul.f32 %v266_v33, %v248_v40  ;;  %v281_v44 = vmul.f32 %v270_v35, %v249_v41  ;;  %v282_v45 = vmul.f32 %v274_v36, %v250_v42  ;;  %v444_v36 = vrot.slane %v439_v24, %v1616_v7 }
  0xb9   :  { %v528_v60 = vld [vmem:[#allocation2 + $0x48] sm:$0xff]  ;;  %v529_v4 = vld [vmem:[#allocation2 + $0x50] sm:$0xff] }
  0xba   :  { %284 = vst [vmem:[#allocation2 + $0x68] sm:$0xf] %v280_v43  ;;  %285 = vst [vmem:[#allocation2 + $0x70] sm:$0xf] %v281_v44  ;;  %v323_v47 = vpop.permute.xlu0 %322  ;;  %v325_v48 = vpop.permute.xlu1 %324  ;;  %v530_v2 = vld [vmem:[#allocation2 + $0x58] sm:$0xff] }
  0xbb   :  { %286 = vst [vmem:[#allocation2 + $0x78] sm:$0xf] %v282_v45  ;;  %v331_v49 = vsel %vm330_vm4, %v323_v47, %v325_v48 }
  0xbc   :  { %v363_v50 = vmul.f32 %v346_v46, %v331_v49  ;;  %v448_v49 = vrot.slane %v439_v24, %v1618_v8 }
  0xbd   :  { %v531_v3 = vld [vmem:[#allocation2 + $0x60] sm:$0xff] }
  0xbe   :  { %367 = vst [vmem:[#allocation2 + $0xa0] sm:$0xf] %v363_v50  ;;  %v327_v55 = vpop.permute.xlu0 %326  ;;  %v329_v56 = vpop.permute.xlu1 %328  ;;  %v1341_v19 = vpack.c.bf16 %v531_v3, %v527_v16 }
  0xbf   :  { %v332_v57 = vsel %vm330_vm4, %v325_v48, %v327_v55  ;;  %v333_v58 = vsel %vm330_vm4, %v327_v55, %v329_v56  ;;  %v339_v59 = vsel %vm330_vm4, %v329_v56, %v323_v47 }
  0xc0   :  { %v364_v61 = vmul.f32 %v350_v51, %v332_v57  ;;  %v365_v62 = vmul.f32 %v354_v52, %v333_v58  ;;  %v366_v63 = vmul.f32 %v358_v53, %v339_v59  ;;  %v452_v51 = vrot.slane %v439_v24, %v1622_v10  ;;  %v488_v53 = vld [vmem:[#allocation7 + $0x20] sm:$0xf] }
  0xc1   :  { %v532_v5 = vld [vmem:[#allocation2 + $0x68] sm:$0xff]  ;;  %v533_v9 = vld [vmem:[#allocation2 + $0x70] sm:$0xff]  ;;  %v456_v52 = vrot.slane %v439_v24, %v1626_v13 }
  0xc2   :  { %v534_v6 = vld [vmem:[#allocation2 + $0x78] sm:$0xff]  ;;  %368 = vst [vmem:[#allocation2 + $0xa8] sm:$0xf] %v364_v61  ;;  %369 = vst [vmem:[#allocation2 + $0xb0] sm:$0xf] %v365_v62  ;;  %v372_v11 = vpop.permute.xlu0 %371  ;;  %v374_v12 = vpop.permute.xlu1 %373  ;;  %v1339_v14 = vpack.c.bf16 %v532_v5, %v528_v60  ;;  %v1357_v17 = vpack.c.bf16 %v533_v9, %v529_v4  ;;  %v493_v62 = vrot.slane %v488_v53, %v1616_v7 }
  0xc3   :  { %370 = vst [vmem:[#allocation2 + $0xb8] sm:$0xf] %v366_v63  ;;  %v1355_v15 = vpack.c.bf16 %v534_v6, %v530_v2  ;;  %v380_v18 = vsel %vm379_vm5, %v372_v11, %v374_v12  ;;  %v497_v4 = vrot.slane %v488_v53, %v1618_v8  ;;  %v501_v5 = vrot.slane %v488_v53, %v1622_v10 }
  0xc4   :  { %v412_v21 = vmul.f32 %v395_v1, %v380_v18  ;;  %1340 = vmatprep.subr.bf16.mxu0 %v1339_v14  ;;  %v505_v6 = vrot.slane %v488_v53, %v1626_v13 }
  0xc5   :  { %1356 = vmatprep.subr.bf16.mxu1 %v1355_v15  ;;  %1342 = vmatpush1.bf16.msra.mxu0 %v1341_v19  ;;  %v539_v38 = vld [vmem:[#allocation2 + $0xa0] sm:$0xff] }
  0xc6   :  { %1358 = vmatpush1.bf16.msra.mxu1 %v1357_v17  ;;  %416 = vst [vmem:[#allocation2 + $0xc0] sm:$0xf] %v412_v21  ;;  %v376_v25 = vpop.permute.xlu0 %375  ;;  %v378_v26 = vpop.permute.xlu1 %377  ;;  %v1345_v48 = vpack.c.bf16 %v539_v38, %v535_v37 }
  0xc7   :  { %v381_v27 = vsel %vm379_vm5, %v374_v12, %v376_v25  ;;  %v382_v28 = vsel %vm379_vm5, %v376_v25, %v378_v26  ;;  %v388_v29 = vsel %vm379_vm5, %v378_v26, %v372_v11 }
  0xc8   :  { %v413_v33 = vmul.f32 %v399_v20, %v381_v27  ;;  %v414_v34 = vmul.f32 %v403_v22, %v382_v28  ;;  %v415_v35 = vmul.f32 %v407_v23, %v388_v29 }
  0xc9   :  { %v540_v39 = vld [vmem:[#allocation2 + $0xa8] sm:$0xff]  ;;  %v541_v41 = vld [vmem:[#allocation2 + $0xb0] sm:$0xff] }
  0xca   :  { %v542_v40 = vld [vmem:[#allocation2 + $0xb8] sm:$0xff]  ;;  %417 = vst [vmem:[#allocation2 + $0xc8] sm:$0xf] %v413_v33  ;;  %418 = vst [vmem:[#allocation2 + $0xd0] sm:$0xf] %v414_v34  ;;  %v421_v42 = vpop.permute.xlu0 %420  ;;  %v423_v43 = vpop.permute.xlu1 %422  ;;  %v1343_v44 = vpack.c.bf16 %v540_v39, %v536_v30  ;;  %v1361_v46 = vpack.c.bf16 %v541_v41, %v537_v32 }
  0xcb   :  { %419 = vst [vmem:[#allocation2 + $0xd8] sm:$0xf] %v415_v35  ;;  %v1359_v45 = vpack.c.bf16 %v542_v40, %v538_v31  ;;  %v429_v47 = vsel %vm428_vm6, %v421_v42, %v423_v43  ;;  %v518_v31 = vld [vmem:[%s1935_s1] sm:$0xff] }
  0xcc   :  { %v461_v50 = vmul.f32 %v444_v36, %v429_v47  ;;  %1344 = vmatprep.subr.bf16.mxu0 %v1343_v44  ;;  %v1154_v44 = vld [vmem:[%s1938_s4] sm:$0xf] }
  0xcd   :  { %1360 = vmatprep.subr.bf16.mxu1 %v1359_v45  ;;  %1346 = vmatpush1.bf16.msra.mxu0 %v1345_v48  ;;  %v543_v28 = vld [vmem:[#allocation2 + $0xc0] sm:$0xff] }
  0xce   :  { %1362 = vmatpush1.bf16.msra.mxu1 %v1361_v46  ;;  %465 = vst [vmem:[#allocation2 + $0xe0] sm:$0xf] %v461_v50  ;;  %v425_v54 = vpop.permute.xlu0 %424  ;;  %v427_v55 = vpop.permute.xlu1 %426 }
  0xcf   :  { %v430_v56 = vsel %vm428_vm6, %v423_v43, %v425_v54  ;;  %v431_v57 = vsel %vm428_vm6, %v425_v54, %v427_v55  ;;  %v437_v58 = vsel %vm428_vm6, %v427_v55, %v421_v42  ;;  %v728_v55 = vld [vmem:[#allocation7] sm:$0xf] }
  0xd0   :  { %v462_v59 = vmul.f32 %v448_v49, %v430_v56  ;;  %v463_v60 = vmul.f32 %v452_v51, %v431_v57  ;;  %v464_v61 = vmul.f32 %v456_v52, %v437_v58  ;;  %v775_v58 = vld [vmem:[#allocation7 + $0x4] sm:$0xf] }
  0xd1   :  { %v544_v16 = vld [vmem:[#allocation2 + $0xc8] sm:$0xff]  ;;  %v545_v22 = vld [vmem:[#allocation2 + $0xd0] sm:$0xff] }
  0xd2   :  { %466 = vst [vmem:[#allocation2 + $0xe8] sm:$0xf] %v462_v59  ;;  %467 = vst [vmem:[#allocation2 + $0xf0] sm:$0xf] %v463_v60  ;;  %v470_v63 = vpop.permute.xlu0 %469  ;;  %v472_v1 = vpop.permute.xlu1 %471  ;;  %v546_v20 = vld [vmem:[#allocation2 + $0xd8] sm:$0xff]  ;;  %v737_v59 = vrot.slane %v728_v55, %v1618_v8  ;;  %v784_v60 = vrot.slane %v775_v58, %v1618_v8 }
  0xd3   :  { %468 = vst [vmem:[#allocation2 + $0xf8] sm:$0xf] %v464_v61  ;;  %v478_v2 = vsel %vm477_vm7, %v470_v63, %v472_v1  ;;  %v1803_v61 = vld [vmem:[#allocation7 + $0x10] sm:$0xf] }
  0xd4   :  { %v510_v3 = vmul.f32 %v493_v62, %v478_v2 }
  0xd5   :  { %v547_v21 = vld [vmem:[#allocation2 + $0xe0] sm:$0xff] }
  0xd6   :  { %514 = vst [vmem:[#allocation2 + $0x100] sm:$0xf] %v510_v3  ;;  %v474_v9 = vpop.permute.xlu0 %473  ;;  %v476_v11 = vpop.permute.xlu1 %475  ;;  %v1349_v30 = vpack.c.bf16 %v547_v21, %v543_v28  ;;  %v916_v3 = vrot.slane %v1803_v61, %v1626_v13 }
  0xd7   :  { %v479_v12 = vsel %vm477_vm7, %v472_v1, %v474_v9  ;;  %v480_v14 = vsel %vm477_vm7, %v474_v9, %v476_v11  ;;  %v486_v15 = vsel %vm477_vm7, %v476_v11, %v470_v63 }
  0xd8   :  { %v511_v17 = vmul.f32 %v497_v4, %v479_v12  ;;  %v512_v18 = vmul.f32 %v501_v5, %v480_v14  ;;  %v513_v19 = vmul.f32 %v505_v6, %v486_v15  ;;  %v1811_v6 = vld [vmem:[#allocation7 + $0x8] sm:$0xf]  ;;  %v912_v14 = vrot.slane %v1803_v61, %v1622_v10 }
  0xd9   :  { %v548_v23 = vld [vmem:[#allocation2 + $0xe8] sm:$0xff]  ;;  %v549_v25 = vld [vmem:[#allocation2 + $0xf0] sm:$0xff]  ;;  %v908_v15 = vrot.slane %v1803_v61, %v1618_v8  ;;  %v839_v28 = vrot.slane %v1811_v6, %v1626_v13 }
  0xda   :  { %v550_v24 = vld [vmem:[#allocation2 + $0xf8] sm:$0xff]  ;;  %515 = vst [vmem:[#allocation2 + $0x108] sm:$0xf] %v511_v17  ;;  %516 = vst [vmem:[#allocation2 + $0x110] sm:$0xf] %v512_v18  ;;  %v1347_v26 = vpack.c.bf16 %v548_v23, %v544_v16  ;;  %v1365_v29 = vpack.c.bf16 %v549_v25, %v545_v22  ;;  %v741_v16 = vrot.slane %v728_v55, %v1622_v10 }
  0xdb   :  { %517 = vst [vmem:[#allocation2 + $0x118] sm:$0xf] %v513_v19  ;;  %v1363_v27 = vpack.c.bf16 %v550_v24, %v546_v20  ;;  %v780_v17 = vrot.slane %v775_v58, %v1616_v7  ;;  %v792_v18 = vrot.slane %v775_v58, %v1626_v13  ;;  %v1822_v19 = vld [vmem:[#allocation7 + $0xc] sm:$0xf]  ;;  %v788_v22 = vrot.slane %v775_v58, %v1622_v10 }
  0xdc   :  { %1348 = vmatprep.subr.bf16.mxu0 %v1347_v26  ;;  %v733_v23 = vrot.slane %v728_v55, %v1616_v7  ;;  %v745_v24 = vrot.slane %v728_v55, %v1626_v13  ;;  %v878_v58 = vrot.slane %v1822_v19, %v1618_v8 }
  0xdd   :  { %1364 = vmatprep.subr.bf16.mxu1 %v1363_v27  ;;  %1350 = vmatpush1.bf16.msra.mxu0 %v1349_v30  ;;  %v551_v35 = vld [vmem:[#allocation2 + $0x100] sm:$0xff]  ;;  %v827_v27 = vrot.slane %v1811_v6, %v1616_v7  ;;  %v835_v30 = vrot.slane %v1811_v6, %v1622_v10 }
  0xde   :  { %1366 = vmatpush1.bf16.msra.mxu1 %v1365_v29  ;;  %v831_v29 = vrot.slane %v1811_v6, %v1618_v8 }
  0xe1   :  { %v552_v32 = vld [vmem:[#allocation2 + $0x108] sm:$0xff]  ;;  %v553_v34 = vld [vmem:[#allocation2 + $0x110] sm:$0xff] }
  0xe2   :  { %v554_v33 = vld [vmem:[#allocation2 + $0x118] sm:$0xff]  ;;  %581 = vmatprep.subr.mxu0 %v552_v32 }
  0xe3   :  { %652 = vmatprep.subr.mxu1 %v554_v33  ;;  %582 = vmatpush1.msra.mxu0 %v551_v35  ;;  %v874_v33 = vrot.slane %v1822_v19, %v1616_v7  ;;  %v946_v35 = vld [vmem:[#allocation7 + $0x14] sm:$0xf] }
  0xe4   :  { %653 = vmatpush1.msra.mxu1 %v553_v34  ;;  %1331 = vmatmul.mubr.msk.f32.vlgmr.msra.gmra.mrb[0].mxu0 %vm561_vm8, %v518_v31  ;;  %v886_v34 = vrot.slane %v1822_v19, %v1626_v13  ;;  %v951_v55 = vrot.slane %v946_v35, %v1616_v7 }
  0xe5   :  { %1332 = vmatmul.mubr.msk.f32.vlgmr.msra.gmra.mrb[0].mxu1 %vm561_vm8, %v518_v31  ;;  %1227 = vmatprep.mubr.f32.mxu0 %v1493_v0 }
  0xe6   :  { %1298 = vmatprep.mubr.f32.mxu1 %v1493_v0 }
  0xe7   :  { %v559_v36 = vpop.permute.xlu0 %558 }
 0x1b7   :  { %v631_v37 = vpop.f32.mrb[0].mxu0 }
 0x1b8   :  { %v702_v38 = vpop.f32.mrb[0].mxu1  ;;  %v1726_v39 = vadd.f32 %v631_v37, %v559_v36  ;;  %v633_v40 = vpop.f32.mrb[1].mxu0 }
 0x1b9   :  { %v704_v41 = vpop.f32.mrb[1].mxu1  ;;  %v1732_v42 = vadd.f32 %v702_v38, %v559_v36  ;;  %v1746_v0 = vadd.f32 %v633_v40, %v559_v36 }
 0x1ba   :  { %929 = vrot.lane.b32.xlu0 %v1726_v39, %s1498_s25  ;;  %714 = vrot.lane.b32.xlu1 %v1726_v39, %s1494_s5  ;;  %v705_v43 = vadd.f32 %v704_v41, %v559_v36 }
 0x1bc   :  { %v1824_v20 = vmul.f32 %v916_v3, %v705_v43 }
 0x1be   :  { %933 = vrot.lane.b32.xlu0 %v1732_v42, %s1498_s25  ;;  %718 = vrot.lane.b32.xlu1 %v1732_v42, %s1494_s5 }
 0x1c2   :  { %976 = vrot.lane.b32.xlu0 %v1726_v39, %s1499_s26  ;;  %761 = vrot.lane.b32.xlu1 %v1726_v39, %s1495_s22 }
 0x1c6   :  { %980 = vrot.lane.b32.xlu0 %v1732_v42, %s1499_s26  ;;  %765 = vrot.lane.b32.xlu1 %v1732_v42, %s1495_s22 }
 0x1ca   :  { %716 = vrot.lane.b32.xlu0 %v1746_v0, %s1494_s5  ;;  %808 = vrot.lane.b32.xlu1 %v1726_v39, %s1496_s23 }
 0x1ce   :  { %758 = vrot.lane.b32.xlu0 %v705_v43, %s1495_s22  ;;  %812 = vrot.lane.b32.xlu1 %v1732_v42, %s1496_s23 }
 0x1d2   :  { %763 = vrot.lane.b32.xlu0 %v1746_v0, %s1495_s22  ;;  %855 = vrot.lane.b32.xlu1 %v1726_v39, %s1497_s24 }
 0x1d6   :  { %805 = vrot.lane.b32.xlu0 %v705_v43, %s1496_s23  ;;  %859 = vrot.lane.b32.xlu1 %v1732_v42, %s1497_s24 }
 0x1da   :  { %810 = vrot.lane.b32.xlu0 %v1746_v0, %s1496_s23  ;;  %708 = vrot.lane.b32.xlu1 %v705_v43, %s1494_s5 }
 0x1de   :  { %852 = vrot.lane.b32.xlu0 %v705_v43, %s1497_s24  ;;  %931 = vrot.lane.b32.xlu1 %v1746_v0, %s1498_s25 }
 0x1e2   :  { %857 = vrot.lane.b32.xlu0 %v1746_v0, %s1497_s24  ;;  %935 = vrot.lane.b32.xlu1 %v705_v43, %s1498_s25 }
 0x1e6   :  { %1023 = vrot.lane.b32.xlu0 %v1726_v39, %s1500_s27  ;;  %978 = vrot.lane.b32.xlu1 %v1746_v0, %s1499_s26 }
 0x1ea   :  { %1027 = vrot.lane.b32.xlu0 %v1732_v42, %s1500_s27  ;;  %982 = vrot.lane.b32.xlu1 %v705_v43, %s1499_s26 }
 0x1ee   :  { %1070 = vrot.lane.b32.xlu0 %v1726_v39, %s1501_s28  ;;  %1025 = vrot.lane.b32.xlu1 %v1746_v0, %s1500_s27 }
 0x1f2   :  { %1074 = vrot.lane.b32.xlu0 %v1732_v42, %s1501_s28  ;;  %1029 = vrot.lane.b32.xlu1 %v705_v43, %s1500_s27 }
 0x1f6   :  { %1157 = vperm.xlu0 %1414, %v1154_v44   ;;  %1072 = vrot.lane.b32.xlu1 %v1746_v0, %s1501_s28 }
 0x1fa   :  { %1076 = vrot.lane.b32.xlu1 %v705_v43, %s1501_s28 }
 0x22c   :  { %v1791_v45 = vpop.permute.xlu0 %929  ;;  %v715_v46 = vpop.permute.xlu1 %714 }
 0x230   :  { %v1793_v47 = vpop.permute.xlu0 %933  ;;  %v719_v48 = vpop.permute.xlu1 %718 }
 0x234   :  { %v1795_v49 = vpop.permute.xlu0 %976  ;;  %v762_v50 = vpop.permute.xlu1 %761 }
 0x238   :  { %v1797_v51 = vpop.permute.xlu0 %980  ;;  %v766_v52 = vpop.permute.xlu1 %765 }
 0x23c   :  { %v717_v53 = vpop.permute.xlu0 %716  ;;  %v1799_v54 = vpop.permute.xlu1 %808 }
 0x23d   :  { %v720_v62 = vsel %vm101_vm0, %v715_v46, %v717_v53  ;;  %v721_v36 = vsel %vm101_vm0, %v717_v53, %v719_v48 }
 0x23e   :  { %v751_v4 = vmul.f32 %v737_v59, %v720_v62  ;;  %v752_v59 = vmul.f32 %v741_v16, %v721_v36  ;;  %v963_v16 = vrot.slane %v946_v35, %v1626_v13 }
 0x240   :  { %v759_v56 = vpop.permute.xlu0 %758  ;;  %v813_v57 = vpop.permute.xlu1 %812 }
 0x241   :  { %v774_v21 = vsel %vm149_vm1, %v759_v56, %v762_v50  ;;  %v769_v25 = vsel %vm149_vm1, %v766_v52, %v759_v56  ;;  %v955_v56 = vrot.slane %v946_v35, %v1618_v8 }
 0x242   :  { %v797_v37 = vmul.f32 %v780_v17, %v774_v21  ;;  %v800_v41 = vmul.f32 %v792_v18, %v769_v25  ;;  %v959_v21 = vrot.slane %v946_v35, %v1622_v10  ;;  %v904_v35 = vrot.slane %v1803_v61, %v1616_v7 }
 0x244   :  { %v764_v63 = vpop.permute.xlu0 %763  ;;  %v1806_v1 = vpop.permute.xlu1 %855 }
 0x245   :  { %v767_v2 = vsel %vm149_vm1, %v762_v50, %v764_v63  ;;  %v768_v26 = vsel %vm149_vm1, %v764_v63, %v766_v52 }
 0x246   :  { %v798_v5 = vmul.f32 %v784_v60, %v767_v2  ;;  %v799_v43 = vmul.f32 %v788_v22, %v768_v26 }
 0x248   :  { %v806_v9 = vpop.permute.xlu0 %805  ;;  %v1813_v11 = vpop.permute.xlu1 %859  ;;  %v1367_v12 = vpack.c.bf16 %v798_v5, %v751_v4  ;;  %v882_v4 = vrot.slane %v1822_v19, %v1622_v10  ;;  %v1385_v5 = vpack.c.bf16 %v799_v43, %v752_v59 }
 0x249   :  { %v816_v52 = vsel %vm198_vm2, %v813_v57, %v806_v9  ;;  %v821_v17 = vsel %vm198_vm2, %v806_v9, %v1799_v54 }
 0x24a   :  { %1368 = vmatprep.subr.bf16.mxu0 %v1367_v12  ;;  %v847_v6 = vmul.f32 %v839_v28, %v816_v52 }
 0x24c   :  { %v811_v31 = vpop.permute.xlu0 %810  ;;  %v709_v32 = vpop.permute.xlu1 %708 }
 0x24d   :  { %v722_v38 = vsel %vm101_vm0, %v719_v48, %v709_v32  ;;  %v727_v40 = vsel %vm101_vm0, %v709_v32, %v715_v46  ;;  %v814_v53 = vsel %vm198_vm2, %v1799_v54, %v811_v31  ;;  %v815_v63 = vsel %vm198_vm2, %v811_v31, %v813_v57 }
 0x24e   :  { %v750_v44 = vmul.f32 %v733_v23, %v727_v40  ;;  %v753_v50 = vmul.f32 %v745_v24, %v722_v38  ;;  %v845_v18 = vmul.f32 %v831_v29, %v814_v53  ;;  %v846_v22 = vmul.f32 %v835_v30, %v815_v63 }
 0x250   :  { %v1369_v48 = vpack.c.bf16 %v797_v37, %v750_v44  ;;  %v853_v60 = vpop.permute.xlu0 %852  ;;  %v932_v46 = vpop.permute.xlu1 %931  ;;  %v1383_v62 = vpack.c.bf16 %v800_v41, %v753_v50  ;;  %v921_v44 = vmul.f32 %v904_v35, %v1726_v39 }
 0x251   :  { %v863_v2 = vsel %vm247_vm3, %v1813_v11, %v853_v60  ;;  %v868_v3 = vsel %vm247_vm3, %v853_v60, %v1806_v1  ;;  %v938_v57 = vsel %vm330_vm4, %v932_v46, %v1793_v47  ;;  %v937_v19 = vsel %vm330_vm4, %v1791_v45, %v932_v46 }
 0x252   :  { %v894_v12 = vmul.f32 %v886_v34, %v863_v2  ;;  %1370 = vmatpush1.bf16.msra.mxu0 %v1369_v48  ;;  %1384 = vmatprep.subr.bf16.mxu1 %v1383_v62  ;;  %v891_v23 = vmul.f32 %v874_v33, %v868_v3  ;;  %v969_v30 = vmul.f32 %v955_v56, %v938_v57 }
 0x253   :  { %1386 = vmatpush1.bf16.msra.mxu1 %v1385_v5  ;;  %v844_v34 = vmul.f32 %v827_v27, %v821_v17  ;;  %v968_v41 = vmul.f32 %v951_v55, %v937_v19  ;;  %v923_v27 = vmul.f32 %v912_v14, %v1732_v42 }
 0x254   :  { %v858_v24 = vpop.permute.xlu0 %857  ;;  %v936_v25 = vpop.permute.xlu1 %935  ;;  %v1387_v26 = vpack.c.bf16 %v894_v12, %v847_v6  ;;  %v1087_v12 = vld [vmem:[#allocation7 + $0x20] sm:$0xf] }
 0x255   :  { %v861_v28 = vsel %vm247_vm3, %v1806_v1, %v858_v24  ;;  %v862_v54 = vsel %vm247_vm3, %v858_v24, %v1813_v11  ;;  %v939_v9 = vsel %vm330_vm4, %v1793_v47, %v936_v25  ;;  %v945_v29 = vsel %vm330_vm4, %v936_v25, %v1791_v45 }
 0x256   :  { %v892_v31 = vmul.f32 %v878_v58, %v861_v28  ;;  %v893_v32 = vmul.f32 %v882_v4, %v862_v54  ;;  %v971_v33 = vmul.f32 %v963_v16, %v945_v29  ;;  %1388 = vmatprep.subr.bf16.mxu1 %v1387_v26  ;;  %v922_v1 = vmul.f32 %v908_v15, %v1746_v0  ;;  %v993_v0 = vld [vmem:[#allocation7 + $0x18] sm:$0xf]  ;;  %v1040_v15 = vld [vmem:[#allocation7 + $0x1c] sm:$0xf] }
 0x257   :  { %v970_v36 = vmul.f32 %v959_v21, %v939_v9  ;;  %v1373_v40 = vpack.c.bf16 %v891_v23, %v844_v34  ;;  %v1377_v56 = vpack.c.bf16 %v968_v41, %v921_v44  ;;  %v998_v55 = vrot.slane %v993_v0, %v1616_v7  ;;  %v1117_v34 = vld [vmem:[%s1937_s3] sm:$0xf]  ;;  %s1503_s3 = smov [#allocation9]  }
 0x258   :  { %v1389_v11 = vpack.c.bf16 %v893_v32, %v846_v22  ;;  %v1024_v47 = vpop.permute.xlu0 %1023  ;;  %v979_v37 = vpop.permute.xlu1 %978  ;;  %v1371_v38 = vpack.c.bf16 %v892_v31, %v845_v18  ;;  %v1391_v45 = vpack.c.bf16 %v971_v33, %v1824_v20  ;;  %v1375_v43 = vpack.c.bf16 %v969_v30, %v922_v1  ;;  %s1321_s10 = sshll.u32 %s1503_s3, 4  ;;  %s1322_s10 = int_to_ptr.vmem [resolvable:$true] %s1321_s10 }
 0x259   :  { %v1393_v50 = vpack.c.bf16 %v970_v36, %v923_v27  ;;  %v1002_v58 = vrot.slane %v993_v0, %v1618_v8  ;;  %v1045_v42 = vrot.slane %v1040_v15, %v1616_v7  ;;  %v1049_v61 = vrot.slane %v1040_v15, %v1618_v8  ;;  %s1461_s11 = scalar_lea.vmem %s1322_s10, 256  ;;  %p1466_p3 = scmp.lt.s32.totalorder %s1322_s10, %s1322_s10 }
 0x25a   :  { %1372 = vmatprep.subr.bf16.mxu0 %v1371_v38  ;;  %1390 = vmatpush1.bf16.msra.mxu1 %v1389_v11  ;;  %v984_v39 = vsel %vm379_vm5, %v1795_v49, %v979_v37  ;;  %v985_v14 = vsel %vm379_vm5, %v979_v37, %v1797_v51  ;;  %v1006_v59 = vrot.slane %v993_v0, %v1622_v10  ;;  %p1462_p2 = scmp.ne.s32.totalorder %s1322_s10, %s1461_s11  ;;  %p1467_p4 = scmp.lt.s32.totalorder %s1461_s11, %s1461_s11 }
 0x25b   :  { %1374 = vmatpush1.bf16.msra.mxu0 %v1373_v40  ;;  %1392 = vmatprep.subr.bf16.mxu1 %v1391_v45  ;;  %v1010_v53 = vrot.slane %v993_v0, %v1626_v13  ;;  %v1053_v62 = vrot.slane %v1040_v15, %v1622_v10  ;;  %v1057_v63 = vrot.slane %v1040_v15, %v1626_v13 }
 0x25c   :  { %v1028_v52 = vpop.permute.xlu0 %1027  ;;  %1376 = vmatprep.subr.bf16.mxu0 %v1375_v43  ;;  %v983_v20 = vpop.permute.xlu1 %982  ;;  %v1015_v2 = vmul.f32 %v998_v55, %v984_v39  ;;  %v1016_v3 = vmul.f32 %v1002_v58, %v985_v14  ;;  %v1092_v19 = vrot.slane %v1087_v12, %v1616_v7  ;;  %v1096_v24 = vrot.slane %v1087_v12, %v1618_v8  ;;  %p1468_p5 = por %p1467_p4, %p1466_p3 }
 0x25d   :  { %v986_v16 = vsel %vm379_vm5, %v1797_v51, %v983_v20  ;;  %v992_v17 = vsel %vm379_vm5, %v983_v20, %v1795_v49  ;;  %v1100_v7 = vrot.slane %v1087_v12, %v1622_v10  ;;  %v1104_v8 = vrot.slane %v1087_v12, %v1626_v13 }
 0x25e   :  { %1394 = vmatpush1.bf16.msra.mxu1 %v1393_v50  ;;  %v1017_v25 = vmul.f32 %v1006_v59, %v986_v16  ;;  %v1018_v26 = vmul.f32 %v1010_v53, %v992_v17  ;;  %p1469_p6 = pnand %p1468_p5, %p1462_p2 }
 0x25f   :  { %1378 = vmatpush1.bf16.msra.mxu0 %v1377_v56 }
 0x260   :  { %v1026_v48 = vpop.permute.xlu1 %1025  ;;  %v1071_v4 = vpop.permute.xlu0 %1070 }
 0x261   :  { %v1031_v60 = vsel %vm428_vm6, %v1024_v47, %v1026_v48  ;;  %v1032_v46 = vsel %vm428_vm6, %v1026_v48, %v1028_v52 }
 0x262   :  { %v1062_v5 = vmul.f32 %v1045_v42, %v1031_v60  ;;  %v1063_v6 = vmul.f32 %v1049_v61, %v1032_v46 }
 0x264   :  { %v1381_v18 = vpack.c.bf16 %v1062_v5, %v1015_v2  ;;  %v1030_v57 = vpop.permute.xlu1 %1029  ;;  %v1379_v21 = vpack.c.bf16 %v1063_v6, %v1016_v3  ;;  %v1075_v51 = vpop.permute.xlu0 %1074 }
 0x265   :  { %v1033_v22 = vsel %vm428_vm6, %v1028_v52, %v1030_v57  ;;  %v1039_v23 = vsel %vm428_vm6, %v1030_v57, %v1024_v47 }
 0x266   :  { %v1064_v28 = vmul.f32 %v1053_v62, %v1033_v22  ;;  %v1065_v54 = vmul.f32 %v1057_v63, %v1039_v23  ;;  %1380 = vmatprep.subr.bf16.mxu0 %v1379_v21 }
 0x267   :  { %1382 = vmatpush1.bf16.msra.mxu0 %v1381_v18 }
 0x268   :  { %v1397_v9 = vpack.c.bf16 %v1064_v28, %v1017_v25  ;;  %v1073_v49 = vpop.permute.xlu1 %1072  ;;  %v1395_v29 = vpack.c.bf16 %v1065_v54, %v1018_v26 }
 0x269   :  { %v1078_v30 = vsel %vm477_vm7, %v1071_v4, %v1073_v49  ;;  %v1079_v31 = vsel %vm477_vm7, %v1073_v49, %v1075_v51 }
 0x26a   :  { %v1109_v32 = vmul.f32 %v1092_v19, %v1078_v30  ;;  %v1110_v33 = vmul.f32 %v1096_v24, %v1079_v31  ;;  %1396 = vmatprep.subr.bf16.mxu1 %v1395_v29 }
 0x26b   :  { %1398 = vmatpush1.bf16.msra.mxu1 %v1397_v9 }
 0x26c   :  { %1179 = vmatprep.subr.mxu0 %v1110_v33  ;;  %v1077_v35 = vpop.permute.xlu1 %1076 }
 0x26d   :  { %v1080_v1 = vsel %vm477_vm7, %v1075_v51, %v1077_v35  ;;  %v1086_v11 = vsel %vm477_vm7, %v1077_v35, %v1071_v4  ;;  %1180 = vmatpush1.msra.mxu0 %v1109_v32 }
 0x26e   :  { %v1111_v36 = vmul.f32 %v1100_v7, %v1080_v1  ;;  %v1112_v47 = vmul.f32 %v1104_v8, %v1086_v11  ;;  %1333 = vmatmul.mubr.msk.f32.vlgmr.msra.gmra.mrb[2].mxu0 %vm561_vm8, %v1117_v34 }
 0x270   :  { %1250 = vmatprep.subr.mxu1 %v1112_v47 }
 0x271   :  { %1251 = vmatpush1.msra.mxu1 %v1111_v36 }
 0x272   :  { %1334 = vmatmul.mubr.msk.f32.vlgmr.msra.gmra.mrb[2].mxu1 %vm561_vm8, %v1117_v34 }
 0x275   :  { %v1158_v10 = vpop.permute.xlu0 %1157 }
 0x341   :  { %v1229_v13 = vpop.f32.mrb[2].mxu0 }
 0x342   :  { %v1230_v37 = vadd.f32 %v1229_v13, %v1158_v10  ;;  %v1231_v38 = vpop.f32.mrb[3].mxu0 }
 0x343   :  { %v1232_v45 = vadd.f32 %v1231_v38, %v1158_v10 }
 0x345   :  { %v1309_v40 = vcombine.low %v1230_v37, %v1232_v45  ;;  %v1300_v41 = vpop.f32.mrb[2].mxu1 }
 0x346   :  { %v1301_v27 = vadd.f32 %v1300_v41, %v1158_v10  ;;  %v1302_v43 = vpop.f32.mrb[3].mxu1 }
 0x347   :  { %1313 = vst [vmem:[#allocation9] sm:$0xff] %v1309_v40  ;;  %v1303_v44 = vadd.f32 %v1302_v43, %v1158_v10 }
 0x349   :  { %v1310_v0 = vcombine.low %v1301_v27, %v1303_v44 }
 0x34b   :  { %1314 = vst [vmem:[#allocation9 + $0x8] sm:$0xff] %v1310_v0 }
 0x34c   :  { %1472 = shalt.err (!%p1469_p6)
}
 0x34d   :  { %s1473_s14 = scalar_lea.hbm %s1940_s6, 256 }
 0x34e   :  { %p1474_p7 = scmp.ne.s32.totalorder %s1940_s6, %s1473_s14  ;;  %p1477_p8 = scmp.lt.u32.totalorder %s1473_s14, %s1940_s6 }
 0x350   :  { %p1479_p9 = pnand %p1477_p8, %p1474_p7 }
 0x352   :  { %1482 = shalt.err (!%p1479_p9)
}
 0x353   :  { %1324 = dma.vmem_to_hbm [thread:$0]  %s1322_s10, 256, %s1940_s6, [#allocation6]  }
 0x354   :  { %1487 = dma.done.wait [#allocation6], 256  }
 0x355   :  { %1488 = vsyncadd [#allocation6], 4294967040 }
 0x356   :  { %1328 = vsyncpa [#allocation5], 1 }
 0x357   :  { %1329 = vsyncpa [#allocation8], 1 }
 0x358   :  { %1330 = vsyncpa [#allocation6], 1 }

</bundles_post_ra>
